<compile_context>
chip_gen: v7x
topology: tpu7x:2x2x1
jax: 0.10.0
libtpu: 0.0.40
codegen_flags: <defaults>
</compile_context>

<pallas_src>
import jax
import jax.numpy as jnp
from jax.experimental import pallas as pl
from jax.experimental.pallas import tpu as pltpu

# ---- problem sizes (small, consistent with the module) -----------------------
N = 16            # number of graph nodes (2 graphs x 8 nodes)
F_IN = 8          # in_features
C = 32            # embed_channels
HEADS = 4
CD = C // HEADS   # GAT per-head channels = 8
D = C // HEADS    # attention q/k/v width = 8   (out = [N, D])
EPS = 1e-5
NEG_SLOPE = 0.2   # GATv2 LeakyReLU slope


def _layernorm(x, gamma, beta):
    mu = jnp.mean(x, axis=-1, keepdims=True)
    var = jnp.mean((x - mu) ** 2, axis=-1, keepdims=True)
    return (x - mu) * jax.lax.rsqrt(var + EPS) * gamma + beta


# ------------------------------- Pallas kernel --------------------------------
def transformer_kernel(tokens_ref, adj_ref, bmask_ref,
                       w_emb_ref, b_emb_ref,
                       wl_ref, wr_ref, a_vec_ref, b_gat_ref,
                       w_w_ref,
                       g1_ref, be1_ref,
                       w1_ref, b1_ref, w2_ref, b2_ref,
                       g2_ref, be2_ref,
                       wq_ref, wk_ref, wv_ref,
                       out_ref):
    neg_inf = jnp.float32(-jnp.inf)
    f32 = jnp.float32

    # ---- embedding: x1 = tokens @ W_emb + b_emb  -> [N, C] ----
    x1 = jnp.dot(tokens_ref[...], w_emb_ref[...],
                 preferred_element_type=f32) + b_emb_ref[...]

    # ---- GATv2Conv (dense, eval mode) ----
    xl = jnp.dot(x1, wl_ref[...], preferred_element_type=f32)   # [N, C] source feats
    xr = jnp.dot(x1, wr_ref[...], preferred_element_type=f32)   # [N, C] target feats

    # scores for all heads/channels at once:
    #   s[i, j, c] = xr[i, c] + xl[j, c]   ->  LeakyReLU  ->  weight by a[c]
    s = xr[:, None, :] + xl[None, :, :]                          # [N, N, C]
    s = jnp.where(s >= 0, s, NEG_SLOPE * s)                      # one LeakyReLU pass
    u = s * a_vec_ref[...][None, :, :]                           # [N, N, C], a in VMEM

    # per-head channel sums -> logits stacked along sublanes: [HEADS*N, N]
    e_heads = [jnp.sum(u[:, :, h * CD:(h + 1) * CD], axis=-1) for h in range(HEADS)]
    e_stk = jnp.concatenate(e_heads, axis=0)                     # [H*N, N]

    # masked softmax over source nodes j, all heads in one pass.
    # NOTE: self-loops guarantee every row has at least one unmasked entry
    # (otherwise exp/-inf rows would produce NaN).
    adj = adj_ref[...]
    adj_stk = jnp.concatenate([adj] * HEADS, axis=0)             # [H*N, N]
    logits = jnp.where(adj_stk > 0.5, e_stk, neg_inf)
    m = jnp.max(logits, axis=-1, keepdims=True)
    p = jnp.exp(logits - m)
    alpha = p * pl.reciprocal(jnp.sum(p, axis=-1, keepdims=True), approx=True)

    # per-head aggregation of source features, then concat heads -> [N, C]
    head_outs = [
        jnp.dot(alpha[h * N:(h + 1) * N, :], xl[:, h * CD:(h + 1) * CD],
                preferred_element_type=f32)
        for h in range(HEADS)
    ]
    gat_out = jnp.concatenate(head_outs, axis=-1) + b_gat_ref[...]

    # ---- GAT block: W(.) + residual, LN, MLP + residual, LN ----
    x2 = jnp.dot(gat_out, w_w_ref[...], preferred_element_type=f32) + x1
    x3 = _layernorm(x2, g1_ref[...], be1_ref[...])
    hmid = jnp.maximum(jnp.dot(x3, w1_ref[...],
                               preferred_element_type=f32) + b1_ref[...], 0.0)
    x4 = jnp.dot(hmid, w2_ref[...], preferred_element_type=f32) + b2_ref[...] + x3
    x5 = _layernorm(x4, g2_ref[...], be2_ref[...])

    # ---- MultiheadAttention block (single 3*D projection, scale 1/d as in spec) ----
    q = jnp.dot(x5, wq_ref[...], preferred_element_type=f32)     # [N, D]
    k = jnp.dot(x5, wk_ref[...], preferred_element_type=f32)     # [N, D]
    v = jnp.dot(x5, wv_ref[...], preferred_element_type=f32)     # [N, D]
    att_logits = jnp.dot(q, k.T, preferred_element_type=f32) * f32(1.0 / D)
    att_logits = jnp.where(bmask_ref[...] > 0.5, neg_inf, att_logits)
    m2 = jnp.max(att_logits, axis=-1, keepdims=True)
    p2 = jnp.exp(att_logits - m2)
    att = p2 * pl.reciprocal(jnp.sum(p2, axis=-1, keepdims=True), approx=True)
    out_ref[...] = jnp.dot(att, v, preferred_element_type=f32)   # [N, D]


# ------------------------------- wrapper ---------------------------------------
def transformer_forward(params, tokens, adj, bmask):
    # kernel-friendly re-arrangements of parameters (trace-time glue, free):
    a_vec = params['att_a'].reshape(1, HEADS * CD)   # flattened GATv2 'a' vector
    wq = params['w_qkv'][:, 0:D]
    wk = params['w_qkv'][:, D:2 * D]
    wv = params['w_qkv'][:, 2 * D:3 * D]

    vmem = pl.BlockSpec(memory_space=pltpu.VMEM)
    return pl.pallas_call(
        transformer_kernel,
        out_shape=jax.ShapeDtypeStruct((N, D), jnp.float32),
        in_specs=[vmem] * 21,
        out_specs=vmem,
    )(tokens, adj, bmask,
      params['w_emb'], params['b_emb'],
      params['w_l'], params['w_r'], a_vec, params['b_gat'],
      params['w_w'],
      params['g1'], params['be1'],
      params['w1'], params['b1'], params['w2'], params['b2'],
      params['g2'], params['be2'],
      wq, wk, wv)


# ------------------------------- pure-JAX reference -----------------------------
def reference_forward(params, tokens, adj, bmask):
    x1 = tokens @ params['w_emb'] + params['b_emb']
    xl = (x1 @ params['w_l']).reshape(N, HEADS, CD)
    xr = (x1 @ params['w_r']).reshape(N, HEADS, CD)
    s = xr[:, None, :, :] + xl[None, :, :, :]                 # [i, j, h, c]
    s = jnp.where(s >= 0, s, NEG_SLOPE * s)
    e = jnp.einsum('ijhc,hc->ijh', s, params['att_a'])
    logits = jnp.where(adj[:, :, None] > 0.5, e, -jnp.inf)
    alpha = jax.nn.softmax(logits, axis=1)
    gat = jnp.einsum('ijh,jhc->ihc', alpha, xl).reshape(N, C) + params['b_gat']
    x2 = gat @ params['w_w'] + x1
    x3 = _layernorm(x2, params['g1'], params['be1'])
    x4 = jnp.maximum(x3 @ params['w1'] + params['b1'], 0) @ params['w2'] + params['b2'] + x3
    x5 = _layernorm(x4, params['g2'], params['be2'])
    qkv = x5 @ params['w_qkv']
    q, k, v = qkv[:, :D], qkv[:, D:2 * D], qkv[:, 2 * D:]
    lg = q @ k.T / D
    lg = jnp.where(bmask > 0.5, -jnp.inf, lg)
    att = jax.nn.softmax(lg, axis=-1)
    return att @ v


if __name__ == "__main__":
    key = jax.random.PRNGKey(0)
    keys = jax.random.split(key, 16)

    # two graphs of 8 nodes each; mask = 1 where nodes belong to different graphs
    batch = jnp.concatenate([jnp.zeros(8, jnp.int32), jnp.ones(8, jnp.int32)])
    bmask = (batch[None, :] != batch[:, None]).astype(jnp.float32)

    # edges: bidirectional ring inside each graph; edge_index[0]=source, [1]=target
    src, dst = [], []
    for g in range(2):
        base = g * 8
        for i in range(8):
            src += [base + i, base + (i + 1) % 8]
            dst += [base + (i + 1) % 8, base + i]
    edge_index = jnp.array([src, dst], jnp.int32)
    adj = jnp.zeros((N, N), jnp.float32)
    adj = adj.at[edge_index[1], edge_index[0]].set(1.0)          # adj[target, source]
    adj = adj.at[jnp.arange(N), jnp.arange(N)].set(1.0)          # GATv2 add_self_loops

    tokens = jax.random.normal(keys[0], (N, F_IN), jnp.float32)

    sc = 0.2
    params = dict(
        w_emb=jax.random.normal(keys[1], (F_IN, C)) * sc,
        b_emb=jax.random.normal(keys[2], (1, C)) * sc,
        w_l=jax.random.normal(keys[3], (C, HEADS * CD)) * sc,
        w_r=jax.random.normal(keys[4], (C, HEADS * CD)) * sc,
        att_a=jax.random.normal(keys[5], (HEADS, CD)) * sc,
        b_gat=jax.random.normal(keys[6], (1, C)) * sc,
        w_w=jax.random.normal(keys[7], (C, C)) * sc,
        g1=jnp.ones((1, C)), be1=jnp.zeros((1, C)),
        w1=jax.random.normal(keys[8], (C, 2 * C)) * sc,
        b1=jax.random.normal(keys[9], (1, 2 * C)) * sc,
        w2=jax.random.normal(keys[10], (2 * C, C)) * sc,
        b2=jax.random.normal(keys[11], (1, C)) * sc,
        g2=jnp.ones((1, C)), be2=jnp.zeros((1, C)),
        w_qkv=jax.random.normal(keys[12], (C, 3 * D)) * sc,
    )
    params = {k: v.astype(jnp.float32) for k, v in params.items()}

    out = transformer_forward(params, tokens, adj, bmask)
    out = jax.block_until_ready(out)

    ref = reference_forward(params, tokens, adj, bmask)
    assert out.shape == (N, D), out.shape
    # tolerance relaxed from 1e-4 because both softmax denominators use the
    # approximate EUP reciprocal (pl.reciprocal(..., approx=True)).
    assert jnp.allclose(out, ref, rtol=5e-3, atol=5e-3), float(jnp.max(jnp.abs(out - ref)))
    print("KERNEL_OK")
</pallas_src>

<mosaic_0001>
module attributes {stable_mosaic.version = 11 : i64} {
  func.func @transformer_kernel(%arg0: memref<16x8xf32, #tpu.memory_space<vmem>>, %arg1: memref<16x16xf32, #tpu.memory_space<vmem>>, %arg2: memref<16x16xf32, #tpu.memory_space<vmem>>, %arg3: memref<8x32xf32, #tpu.memory_space<vmem>>, %arg4: memref<1x32xf32, #tpu.memory_space<vmem>>, %arg5: memref<32x32xf32, #tpu.memory_space<vmem>>, %arg6: memref<32x32xf32, #tpu.memory_space<vmem>>, %arg7: memref<1x32xf32, #tpu.memory_space<vmem>>, %arg8: memref<1x32xf32, #tpu.memory_space<vmem>>, %arg9: memref<32x32xf32, #tpu.memory_space<vmem>>, %arg10: memref<1x32xf32, #tpu.memory_space<vmem>>, %arg11: memref<1x32xf32, #tpu.memory_space<vmem>>, %arg12: memref<32x64xf32, #tpu.memory_space<vmem>>, %arg13: memref<1x64xf32, #tpu.memory_space<vmem>>, %arg14: memref<64x32xf32, #tpu.memory_space<vmem>>, %arg15: memref<1x32xf32, #tpu.memory_space<vmem>>, %arg16: memref<1x32xf32, #tpu.memory_space<vmem>>, %arg17: memref<1x32xf32, #tpu.memory_space<vmem>>, %arg18: memref<32x8xf32, #tpu.memory_space<vmem>>, %arg19: memref<32x8xf32, #tpu.memory_space<vmem>>, %arg20: memref<32x8xf32, #tpu.memory_space<vmem>>, %arg21: memref<16x8xf32, #tpu.memory_space<vmem>>) attributes {dimension_semantics = [], scalar_prefetch = 0 : i64, scratch_operands = 0 : i64, tpu.core_type = #tpu.core_type<tc>} {
    %c0 = arith.constant 0 : index
    %c0_0 = arith.constant 0 : index
    %0 = vector.load %arg0[%c0, %c0_0] : memref<16x8xf32, #tpu.memory_space<vmem>>, vector<16x8xf32>
    %c0_1 = arith.constant 0 : index
    %c0_2 = arith.constant 0 : index
    %1 = vector.load %arg3[%c0_1, %c0_2] : memref<8x32xf32, #tpu.memory_space<vmem>>, vector<8x32xf32>
    %cst = arith.constant dense<0.000000e+00> : vector<16x32xf32>
    %2 = tpu.matmul %0, %1, %cst {dimension_numbers = #tpu.dot_dimension_numbers<[1], [0], [0], [1], [0, 0, 1, 1], [], []>} : vector<16x8xf32>, vector<8x32xf32>, vector<16x32xf32> -> vector<16x32xf32>
    %c0_3 = arith.constant 0 : index
    %c0_4 = arith.constant 0 : index
    %3 = vector.load %arg4[%c0_3, %c0_4] : memref<1x32xf32, #tpu.memory_space<vmem>>, vector<1x32xf32>
    %4 = vector.broadcast %3 : vector<1x32xf32> to vector<16x32xf32>
    %5 = arith.addf %2, %4 : vector<16x32xf32>
    %c0_5 = arith.constant 0 : index
    %c0_6 = arith.constant 0 : index
    %6 = vector.load %arg5[%c0_5, %c0_6] : memref<32x32xf32, #tpu.memory_space<vmem>>, vector<32x32xf32>
    %cst_7 = arith.constant dense<0.000000e+00> : vector<16x32xf32>
    %7 = tpu.matmul %5, %6, %cst_7 {dimension_numbers = #tpu.dot_dimension_numbers<[1], [0], [0], [1], [0, 0, 1, 1], [], []>} : vector<16x32xf32>, vector<32x32xf32>, vector<16x32xf32> -> vector<16x32xf32>
    %c0_8 = arith.constant 0 : index
    %c0_9 = arith.constant 0 : index
    %8 = vector.load %arg6[%c0_8, %c0_9] : memref<32x32xf32, #tpu.memory_space<vmem>>, vector<32x32xf32>
    %cst_10 = arith.constant dense<0.000000e+00> : vector<16x32xf32>
    %9 = tpu.matmul %5, %8, %cst_10 {dimension_numbers = #tpu.dot_dimension_numbers<[1], [0], [0], [1], [0, 0, 1, 1], [], []>} : vector<16x32xf32>, vector<32x32xf32>, vector<16x32xf32> -> vector<16x32xf32>
    %10 = vector.shape_cast %9 : vector<16x32xf32> to vector<16x1x32xf32>
    %11 = vector.shape_cast %7 : vector<16x32xf32> to vector<1x16x32xf32>
    %12 = vector.broadcast %10 : vector<16x1x32xf32> to vector<16x16x32xf32>
    %13 = vector.broadcast %11 : vector<1x16x32xf32> to vector<16x16x32xf32>
    %14 = arith.addf %12, %13 : vector<16x16x32xf32>
    %cst_11 = arith.constant 0.000000e+00 : f32
    %15 = vector.broadcast %cst_11 : f32 to vector<16x16x32xf32>
    %16 = arith.cmpf oge, %14, %15 : vector<16x16x32xf32>
    %cst_12 = arith.constant 2.000000e-01 : f32
    %17 = vector.broadcast %cst_12 : f32 to vector<16x16x32xf32>
    %18 = arith.mulf %17, %14 : vector<16x16x32xf32>
    %19 = arith.select %16, %14, %18 : vector<16x16x32xi1>, vector<16x16x32xf32>
    %c0_13 = arith.constant 0 : index
    %c0_14 = arith.constant 0 : index
    %20 = vector.load %arg7[%c0_13, %c0_14] : memref<1x32xf32, #tpu.memory_space<vmem>>, vector<1x32xf32>
    %21 = vector.shape_cast %20 : vector<1x32xf32> to vector<1x1x32xf32>
    %22 = vector.broadcast %21 : vector<1x1x32xf32> to vector<16x16x32xf32>
    %23 = arith.mulf %19, %22 : vector<16x16x32xf32>
    %24 = vector.extract_strided_slice %23 {offsets = [0, 0, 0], sizes = [16, 16, 8], strides = [1, 1, 1]} : vector<16x16x32xf32> to vector<16x16x8xf32>
    %cst_15 = arith.constant dense<0.000000e+00> : vector<16x16xf32>
    %25 = vector.multi_reduction <add>, %24, %cst_15 [2] : vector<16x16x8xf32> to vector<16x16xf32>
    %26 = vector.extract_strided_slice %23 {offsets = [0, 0, 8], sizes = [16, 16, 8], strides = [1, 1, 1]} : vector<16x16x32xf32> to vector<16x16x8xf32>
    %cst_16 = arith.constant dense<0.000000e+00> : vector<16x16xf32>
    %27 = vector.multi_reduction <add>, %26, %cst_16 [2] : vector<16x16x8xf32> to vector<16x16xf32>
    %28 = vector.extract_strided_slice %23 {offsets = [0, 0, 16], sizes = [16, 16, 8], strides = [1, 1, 1]} : vector<16x16x32xf32> to vector<16x16x8xf32>
    %cst_17 = arith.constant dense<0.000000e+00> : vector<16x16xf32>
    %29 = vector.multi_reduction <add>, %28, %cst_17 [2] : vector<16x16x8xf32> to vector<16x16xf32>
    %30 = vector.extract_strided_slice %23 {offsets = [0, 0, 24], sizes = [16, 16, 8], strides = [1, 1, 1]} : vector<16x16x32xf32> to vector<16x16x8xf32>
    %cst_18 = arith.constant dense<0.000000e+00> : vector<16x16xf32>
    %31 = vector.multi_reduction <add>, %30, %cst_18 [2] : vector<16x16x8xf32> to vector<16x16xf32>
    %32 = tpu.concatenate %25, %27, %29, %31 in 0 : vector<16x16xf32>, vector<16x16xf32>, vector<16x16xf32>, vector<16x16xf32> -> vector<64x16xf32>
    %c0_19 = arith.constant 0 : index
    %c0_20 = arith.constant 0 : index
    %33 = vector.load %arg1[%c0_19, %c0_20] : memref<16x16xf32, #tpu.memory_space<vmem>>, vector<16x16xf32>
    %34 = tpu.concatenate %33, %33, %33, %33 in 0 : vector<16x16xf32>, vector<16x16xf32>, vector<16x16xf32>, vector<16x16xf32> -> vector<64x16xf32>
    %cst_21 = arith.constant 5.000000e-01 : f32
    %35 = vector.broadcast %cst_21 : f32 to vector<64x16xf32>
    %36 = arith.cmpf ogt, %34, %35 : vector<64x16xf32>
    %cst_22 = arith.constant 0xFF800000 : f32
    %37 = vector.broadcast %cst_22 : f32 to vector<64x16xf32>
    %38 = arith.select %36, %32, %37 : vector<64x16xi1>, vector<64x16xf32>
    %cst_23 = arith.constant dense<0xFF800000> : vector<64xf32>
    %39 = vector.multi_reduction <maximumf>, %38, %cst_23 [1] : vector<64x16xf32> to vector<64xf32>
    %40 = vector.shape_cast %39 : vector<64xf32> to vector<64x1xf32>
    %41 = vector.broadcast %40 : vector<64x1xf32> to vector<64x16xf32>
    %42 = arith.subf %38, %41 : vector<64x16xf32>
    %43 = math.exp %42 : vector<64x16xf32>
    %cst_24 = arith.constant dense<0.000000e+00> : vector<64xf32>
    %44 = vector.multi_reduction <add>, %43, %cst_24 [1] : vector<64x16xf32> to vector<64xf32>
    %45 = vector.shape_cast %44 : vector<64xf32> to vector<64x1xf32>
    %46 = tpu.reciprocal %45 {approx = true} : vector<64x1xf32> -> vector<64x1xf32>
    %47 = vector.broadcast %46 : vector<64x1xf32> to vector<64x16xf32>
    %48 = arith.mulf %43, %47 : vector<64x16xf32>
    %49 = vector.extract_strided_slice %48 {offsets = [0, 0], sizes = [16, 16], strides = [1, 1]} : vector<64x16xf32> to vector<16x16xf32>
    %50 = vector.extract_strided_slice %7 {offsets = [0, 0], sizes = [16, 8], strides = [1, 1]} : vector<16x32xf32> to vector<16x8xf32>
    %cst_25 = arith.constant dense<0.000000e+00> : vector<16x8xf32>
    %51 = tpu.matmul %49, %50, %cst_25 {dimension_numbers = #tpu.dot_dimension_numbers<[1], [0], [0], [1], [0, 0, 1, 1], [], []>} : vector<16x16xf32>, vector<16x8xf32>, vector<16x8xf32> -> vector<16x8xf32>
    %52 = vector.extract_strided_slice %48 {offsets = [16, 0], sizes = [16, 16], strides = [1, 1]} : vector<64x16xf32> to vector<16x16xf32>
    %53 = vector.extract_strided_slice %7 {offsets = [0, 8], sizes = [16, 8], strides = [1, 1]} : vector<16x32xf32> to vector<16x8xf32>
    %cst_26 = arith.constant dense<0.000000e+00> : vector<16x8xf32>
    %54 = tpu.matmul %52, %53, %cst_26 {dimension_numbers = #tpu.dot_dimension_numbers<[1], [0], [0], [1], [0, 0, 1, 1], [], []>} : vector<16x16xf32>, vector<16x8xf32>, vector<16x8xf32> -> vector<16x8xf32>
    %55 = vector.extract_strided_slice %48 {offsets = [32, 0], sizes = [16, 16], strides = [1, 1]} : vector<64x16xf32> to vector<16x16xf32>
    %56 = vector.extract_strided_slice %7 {offsets = [0, 16], sizes = [16, 8], strides = [1, 1]} : vector<16x32xf32> to vector<16x8xf32>
    %cst_27 = arith.constant dense<0.000000e+00> : vector<16x8xf32>
    %57 = tpu.matmul %55, %56, %cst_27 {dimension_numbers = #tpu.dot_dimension_numbers<[1], [0], [0], [1], [0, 0, 1, 1], [], []>} : vector<16x16xf32>, vector<16x8xf32>, vector<16x8xf32> -> vector<16x8xf32>
    %58 = vector.extract_strided_slice %48 {offsets = [48, 0], sizes = [16, 16], strides = [1, 1]} : vector<64x16xf32> to vector<16x16xf32>
    %59 = vector.extract_strided_slice %7 {offsets = [0, 24], sizes = [16, 8], strides = [1, 1]} : vector<16x32xf32> to vector<16x8xf32>
    %cst_28 = arith.constant dense<0.000000e+00> : vector<16x8xf32>
    %60 = tpu.matmul %58, %59, %cst_28 {dimension_numbers = #tpu.dot_dimension_numbers<[1], [0], [0], [1], [0, 0, 1, 1], [], []>} : vector<16x16xf32>, vector<16x8xf32>, vector<16x8xf32> -> vector<16x8xf32>
    %61 = tpu.concatenate %51, %54, %57, %60 in 1 : vector<16x8xf32>, vector<16x8xf32>, vector<16x8xf32>, vector<16x8xf32> -> vector<16x32xf32>
    %c0_29 = arith.constant 0 : index
    %c0_30 = arith.constant 0 : index
    %62 = vector.load %arg8[%c0_29, %c0_30] : memref<1x32xf32, #tpu.memory_space<vmem>>, vector<1x32xf32>
    %63 = vector.broadcast %62 : vector<1x32xf32> to vector<16x32xf32>
    %64 = arith.addf %61, %63 : vector<16x32xf32>
    %c0_31 = arith.constant 0 : index
    %c0_32 = arith.constant 0 : index
    %65 = vector.load %arg9[%c0_31, %c0_32] : memref<32x32xf32, #tpu.memory_space<vmem>>, vector<32x32xf32>
    %cst_33 = arith.constant dense<0.000000e+00> : vector<16x32xf32>
    %66 = tpu.matmul %64, %65, %cst_33 {dimension_numbers = #tpu.dot_dimension_numbers<[1], [0], [0], [1], [0, 0, 1, 1], [], []>} : vector<16x32xf32>, vector<32x32xf32>, vector<16x32xf32> -> vector<16x32xf32>
    %67 = arith.addf %66, %5 : vector<16x32xf32>
    %c0_34 = arith.constant 0 : index
    %c0_35 = arith.constant 0 : index
    %68 = vector.load %arg10[%c0_34, %c0_35] : memref<1x32xf32, #tpu.memory_space<vmem>>, vector<1x32xf32>
    %c0_36 = arith.constant 0 : index
    %c0_37 = arith.constant 0 : index
    %69 = vector.load %arg11[%c0_36, %c0_37] : memref<1x32xf32, #tpu.memory_space<vmem>>, vector<1x32xf32>
    %cst_38 = arith.constant dense<0.000000e+00> : vector<16xf32>
    %70 = vector.multi_reduction <add>, %67, %cst_38 [1] : vector<16x32xf32> to vector<16xf32>
    %71 = vector.shape_cast %70 : vector<16xf32> to vector<16x1xf32>
    %cst_39 = arith.constant 3.200000e+01 : f32
    %72 = vector.broadcast %cst_39 : f32 to vector<16x1xf32>
    %73 = arith.divf %71, %72 : vector<16x1xf32>
    %74 = vector.broadcast %73 : vector<16x1xf32> to vector<16x32xf32>
    %75 = arith.subf %67, %74 : vector<16x32xf32>
    %76 = arith.mulf %75, %75 : vector<16x32xf32>
    %cst_40 = arith.constant dense<0.000000e+00> : vector<16xf32>
    %77 = vector.multi_reduction <add>, %76, %cst_40 [1] : vector<16x32xf32> to vector<16xf32>
    %78 = vector.shape_cast %77 : vector<16xf32> to vector<16x1xf32>
    %cst_41 = arith.constant 3.200000e+01 : f32
    %79 = vector.broadcast %cst_41 : f32 to vector<16x1xf32>
    %80 = arith.divf %78, %79 : vector<16x1xf32>
    %81 = vector.broadcast %73 : vector<16x1xf32> to vector<16x32xf32>
    %82 = arith.subf %67, %81 : vector<16x32xf32>
    %cst_42 = arith.constant 9.99999974E-6 : f32
    %83 = vector.broadcast %cst_42 : f32 to vector<16x1xf32>
    %84 = arith.addf %80, %83 : vector<16x1xf32>
    %85 = math.rsqrt %84 : vector<16x1xf32>
    %86 = vector.broadcast %85 : vector<16x1xf32> to vector<16x32xf32>
    %87 = arith.mulf %82, %86 : vector<16x32xf32>
    %88 = vector.broadcast %68 : vector<1x32xf32> to vector<16x32xf32>
    %89 = arith.mulf %87, %88 : vector<16x32xf32>
    %90 = vector.broadcast %69 : vector<1x32xf32> to vector<16x32xf32>
    %91 = arith.addf %89, %90 : vector<16x32xf32>
    %c0_43 = arith.constant 0 : index
    %c0_44 = arith.constant 0 : index
    %92 = vector.load %arg12[%c0_43, %c0_44] : memref<32x64xf32, #tpu.memory_space<vmem>>, vector<32x64xf32>
    %cst_45 = arith.constant dense<0.000000e+00> : vector<16x64xf32>
    %93 = tpu.matmul %91, %92, %cst_45 {dimension_numbers = #tpu.dot_dimension_numbers<[1], [0], [0], [1], [0, 0, 1, 1], [], []>} : vector<16x32xf32>, vector<32x64xf32>, vector<16x64xf32> -> vector<16x64xf32>
    %c0_46 = arith.constant 0 : index
    %c0_47 = arith.constant 0 : index
    %94 = vector.load %arg13[%c0_46, %c0_47] : memref<1x64xf32, #tpu.memory_space<vmem>>, vector<1x64xf32>
    %95 = vector.broadcast %94 : vector<1x64xf32> to vector<16x64xf32>
    %96 = arith.addf %93, %95 : vector<16x64xf32>
    %cst_48 = arith.constant 0.000000e+00 : f32
    %97 = vector.broadcast %cst_48 : f32 to vector<16x64xf32>
    %98 = arith.maximumf %96, %97 : vector<16x64xf32>
    %c0_49 = arith.constant 0 : index
    %c0_50 = arith.constant 0 : index
    %99 = vector.load %arg14[%c0_49, %c0_50] : memref<64x32xf32, #tpu.memory_space<vmem>>, vector<64x32xf32>
    %cst_51 = arith.constant dense<0.000000e+00> : vector<16x32xf32>
    %100 = tpu.matmul %98, %99, %cst_51 {dimension_numbers = #tpu.dot_dimension_numbers<[1], [0], [0], [1], [0, 0, 1, 1], [], []>} : vector<16x64xf32>, vector<64x32xf32>, vector<16x32xf32> -> vector<16x32xf32>
    %c0_52 = arith.constant 0 : index
    %c0_53 = arith.constant 0 : index
    %101 = vector.load %arg15[%c0_52, %c0_53] : memref<1x32xf32, #tpu.memory_space<vmem>>, vector<1x32xf32>
    %102 = vector.broadcast %101 : vector<1x32xf32> to vector<16x32xf32>
    %103 = arith.addf %100, %102 : vector<16x32xf32>
    %104 = arith.addf %103, %91 : vector<16x32xf32>
    %c0_54 = arith.constant 0 : index
    %c0_55 = arith.constant 0 : index
    %105 = vector.load %arg16[%c0_54, %c0_55] : memref<1x32xf32, #tpu.memory_space<vmem>>, vector<1x32xf32>
    %c0_56 = arith.constant 0 : index
    %c0_57 = arith.constant 0 : index
    %106 = vector.load %arg17[%c0_56, %c0_57] : memref<1x32xf32, #tpu.memory_space<vmem>>, vector<1x32xf32>
    %cst_58 = arith.constant dense<0.000000e+00> : vector<16xf32>
    %107 = vector.multi_reduction <add>, %104, %cst_58 [1] : vector<16x32xf32> to vector<16xf32>
    %108 = vector.shape_cast %107 : vector<16xf32> to vector<16x1xf32>
    %cst_59 = arith.constant 3.200000e+01 : f32
    %109 = vector.broadcast %cst_59 : f32 to vector<16x1xf32>
    %110 = arith.divf %108, %109 : vector<16x1xf32>
    %111 = vector.broadcast %110 : vector<16x1xf32> to vector<16x32xf32>
    %112 = arith.subf %104, %111 : vector<16x32xf32>
    %113 = arith.mulf %112, %112 : vector<16x32xf32>
    %cst_60 = arith.constant dense<0.000000e+00> : vector<16xf32>
    %114 = vector.multi_reduction <add>, %113, %cst_60 [1] : vector<16x32xf32> to vector<16xf32>
    %115 = vector.shape_cast %114 : vector<16xf32> to vector<16x1xf32>
    %cst_61 = arith.constant 3.200000e+01 : f32
    %116 = vector.broadcast %cst_61 : f32 to vector<16x1xf32>
    %117 = arith.divf %115, %116 : vector<16x1xf32>
    %118 = vector.broadcast %110 : vector<16x1xf32> to vector<16x32xf32>
    %119 = arith.subf %104, %118 : vector<16x32xf32>
    %cst_62 = arith.constant 9.99999974E-6 : f32
    %120 = vector.broadcast %cst_62 : f32 to vector<16x1xf32>
    %121 = arith.addf %117, %120 : vector<16x1xf32>
    %122 = math.rsqrt %121 : vector<16x1xf32>
    %123 = vector.broadcast %122 : vector<16x1xf32> to vector<16x32xf32>
    %124 = arith.mulf %119, %123 : vector<16x32xf32>
    %125 = vector.broadcast %105 : vector<1x32xf32> to vector<16x32xf32>
    %126 = arith.mulf %124, %125 : vector<16x32xf32>
    %127 = vector.broadcast %106 : vector<1x32xf32> to vector<16x32xf32>
    %128 = arith.addf %126, %127 : vector<16x32xf32>
    %c0_63 = arith.constant 0 : index
    %c0_64 = arith.constant 0 : index
    %129 = vector.load %arg18[%c0_63, %c0_64] : memref<32x8xf32, #tpu.memory_space<vmem>>, vector<32x8xf32>
    %cst_65 = arith.constant dense<0.000000e+00> : vector<16x8xf32>
    %130 = tpu.matmul %128, %129, %cst_65 {dimension_numbers = #tpu.dot_dimension_numbers<[1], [0], [0], [1], [0, 0, 1, 1], [], []>} : vector<16x32xf32>, vector<32x8xf32>, vector<16x8xf32> -> vector<16x8xf32>
    %c0_66 = arith.constant 0 : index
    %c0_67 = arith.constant 0 : index
    %131 = vector.load %arg19[%c0_66, %c0_67] : memref<32x8xf32, #tpu.memory_space<vmem>>, vector<32x8xf32>
    %cst_68 = arith.constant dense<0.000000e+00> : vector<16x8xf32>
    %132 = tpu.matmul %128, %131, %cst_68 {dimension_numbers = #tpu.dot_dimension_numbers<[1], [0], [0], [1], [0, 0, 1, 1], [], []>} : vector<16x32xf32>, vector<32x8xf32>, vector<16x8xf32> -> vector<16x8xf32>
    %c0_69 = arith.constant 0 : index
    %c0_70 = arith.constant 0 : index
    %133 = vector.load %arg20[%c0_69, %c0_70] : memref<32x8xf32, #tpu.memory_space<vmem>>, vector<32x8xf32>
    %cst_71 = arith.constant dense<0.000000e+00> : vector<16x8xf32>
    %134 = tpu.matmul %128, %133, %cst_71 {dimension_numbers = #tpu.dot_dimension_numbers<[1], [0], [0], [1], [0, 0, 1, 1], [], []>} : vector<16x32xf32>, vector<32x8xf32>, vector<16x8xf32> -> vector<16x8xf32>
    %135 = tpu.transpose %132, [1, 0] : vector<16x8xf32> -> vector<8x16xf32>
    %cst_72 = arith.constant dense<0.000000e+00> : vector<16x16xf32>
    %136 = tpu.matmul %130, %135, %cst_72 {dimension_numbers = #tpu.dot_dimension_numbers<[1], [0], [0], [1], [0, 0, 1, 1], [], []>} : vector<16x8xf32>, vector<8x16xf32>, vector<16x16xf32> -> vector<16x16xf32>
    %cst_73 = arith.constant 1.250000e-01 : f32
    %137 = vector.broadcast %cst_73 : f32 to vector<16x16xf32>
    %138 = arith.mulf %136, %137 : vector<16x16xf32>
    %c0_74 = arith.constant 0 : index
    %c0_75 = arith.constant 0 : index
    %139 = vector.load %arg2[%c0_74, %c0_75] : memref<16x16xf32, #tpu.memory_space<vmem>>, vector<16x16xf32>
    %cst_76 = arith.constant 5.000000e-01 : f32
    %140 = vector.broadcast %cst_76 : f32 to vector<16x16xf32>
    %141 = arith.cmpf ogt, %139, %140 : vector<16x16xf32>
    %cst_77 = arith.constant 0xFF800000 : f32
    %142 = vector.broadcast %cst_77 : f32 to vector<16x16xf32>
    %143 = arith.select %141, %142, %138 : vector<16x16xi1>, vector<16x16xf32>
    %cst_78 = arith.constant dense<0xFF800000> : vector<16xf32>
    %144 = vector.multi_reduction <maximumf>, %143, %cst_78 [1] : vector<16x16xf32> to vector<16xf32>
    %145 = vector.shape_cast %144 : vector<16xf32> to vector<16x1xf32>
    %146 = vector.broadcast %145 : vector<16x1xf32> to vector<16x16xf32>
    %147 = arith.subf %143, %146 : vector<16x16xf32>
    %148 = math.exp %147 : vector<16x16xf32>
    %cst_79 = arith.constant dense<0.000000e+00> : vector<16xf32>
    %149 = vector.multi_reduction <add>, %148, %cst_79 [1] : vector<16x16xf32> to vector<16xf32>
    %150 = vector.shape_cast %149 : vector<16xf32> to vector<16x1xf32>
    %151 = tpu.reciprocal %150 {approx = true} : vector<16x1xf32> -> vector<16x1xf32>
    %152 = vector.broadcast %151 : vector<16x1xf32> to vector<16x16xf32>
    %153 = arith.mulf %148, %152 : vector<16x16xf32>
    %cst_80 = arith.constant dense<0.000000e+00> : vector<16x8xf32>
    %154 = tpu.matmul %153, %134, %cst_80 {dimension_numbers = #tpu.dot_dimension_numbers<[1], [0], [0], [1], [0, 0, 1, 1], [], []>} : vector<16x16xf32>, vector<16x8xf32>, vector<16x8xf32> -> vector<16x8xf32>
    %c0_81 = arith.constant 0 : index
    %c0_82 = arith.constant 0 : index
    %155 = vector.load %arg21[%c0_81, %c0_82] : memref<16x8xf32, #tpu.memory_space<vmem>>, vector<16x8xf32>
    tpu.vector_store %arg21[%c0_81, %c0_82], %154 {strides = array<i32>} : memref<16x8xf32, #tpu.memory_space<vmem>>, vector<16x8xf32>,
    return
  }
}

</mosaic_0001>

<bundles_post_ra>
// kernel: tpu_custom_call.1
= control target key start
LH: loop header
LB: loop body
LE: loop exit
PB: predicated region body
PF: predicated region fallthrough
CT: control target
= control target key end

     0   :  { %vm78_vm0 = vcmask 64512   ;;  %vm164_vm1 = vcmask 261120   ;;  %v331_v20 = vlaneseq  ;;  %v3885_v26 = vmov 1966171168   ;;  %s3887_s27 = smov 112   ;;  %s5734_s3 = inlined_call_operand.vmem [shape: f32[8,32], index: 3, kind: input, shape index: {}]   ;;  %s5735_s0 = inlined_call_operand.vmem [shape: f32[16,8], index: 0, kind: input, shape index: {}]   ;;  %s5736_s5 = inlined_call_operand.vmem [shape: f32[32,32], index: 5, kind: input, shape index: {}]   ;;  %s5737_s6 = inlined_call_operand.vmem [shape: f32[32,32], index: 6, kind: input, shape index: {}]   ;;  %s5738_s4 = inlined_call_operand.vmem [shape: f32[1,32], index: 4, kind: input, shape index: {}]   ;;  %s5739_s7 = inlined_call_operand.vmem [shape: f32[1,32], index: 7, kind: input, shape index: {}]   ;;  %s5740_s1 = inlined_call_operand.vmem [shape: f32[16,16], index: 1, kind: input, shape index: {}]   ;;  %s5741_s9 = inlined_call_operand.vmem [shape: f32[32,32], index: 9, kind: input, shape index: {}]   ;;  %s5742_s8 = inlined_call_operand.vmem [shape: f32[1,32], index: 8, kind: input, shape index: {}]   ;;  %s5743_s12 = inlined_call_operand.vmem [shape: f32[32,64], index: 12, kind: input, shape index: {}]   ;;  %s5744_s14 = inlined_call_operand.vmem [shape: f32[64,32], index: 14, kind: input, shape index: {}]   ;;  %s5745_s10 = inlined_call_operand.vmem [shape: f32[1,32], index: 10, kind: input, shape index: {}]   ;;  %s5746_s11 = inlined_call_operand.vmem [shape: f32[1,32], index: 11, kind: input, shape index: {}]   ;;  %s5747_s13 = inlined_call_operand.vmem [shape: f32[1,64], index: 13, kind: input, shape index: {}]   ;;  %s5748_s15 = inlined_call_operand.vmem [shape: f32[1,32], index: 15, kind: input, shape index: {}]   ;;  %s5749_s18 = inlined_call_operand.vmem [shape: f32[32,8], index: 18, kind: input, shape index: {}]   ;;  %s5750_s20 = inlined_call_operand.vmem [shape: f32[32,8], index: 20, kind: input, shape index: {}]   ;;  %s5751_s19 = inlined_call_operand.vmem [shape: f32[32,8], index: 19, kind: input, shape index: {}]   ;;  %s5752_s16 = inlined_call_operand.vmem [shape: f32[1,32], index: 16, kind: input, shape index: {}]   ;;  %s5753_s17 = inlined_call_operand.vmem [shape: f32[1,32], index: 17, kind: input, shape index: {}]   ;;  %s5754_s2 = inlined_call_operand.vmem [shape: f32[16,16], index: 2, kind: input, shape index: {}]   ;;  %s5755_s21 = inlined_call_operand.vmem [shape: f32[16,8], index: 21, kind: output, shape index: {}]  }
   0x1   :  { %5764 = sst [smem:[#allocation40_spill]] %s5734_s3  ;;  %v329_v27 = vunpack.c.l.s4 %v3885_v26 }
   0x2   :  { %5765 = sst [smem:[#allocation41_spill]] %s5735_s0  ;;  %s5770_s26 = sld [smem:[#allocation40_spill]]  ;;  %v332_v21 = vshrl.u32 %v331_v20, 7  ;;  %v1409_v22 = vand.u32 127, %v331_v20 }
   0x3   :  { %5766 = sst [smem:[#allocation42_spill]] %s5736_s5  ;;  %s5771_s28 = sld [smem:[#allocation41_spill]]  ;;  %v330_v28 = vunpack.c.0.s8 %v329_v27 }
   0x4   :  { %5767 = sst [smem:[#allocation43_spill]] %s5737_s6  ;;  %v4052_v23 = vsub.s32 %v1409_v22, %v332_v21  ;;  %v1414_v24 = vadd.s32 4294967288, %v1409_v22  ;;  %v427_v34 = vsub.s32 0, %v332_v21  ;;  %s3888_s6 = smov 104  }
   0x5   :  { %5768 = sst [smem:[#allocation44_spill]] %s5738_s4  ;;  %s5773_s5 = sld [smem:[#allocation43_spill]]  ;;  %v333_v29 = vsub.s32 %v330_v28, %v332_v21 }
   0x6   :  { %5769 = sst [smem:[#allocation45_spill]] %s5739_s7  ;;  %s5772_s7 = sld [smem:[#allocation42_spill]]  ;;  %v4054_v25 = vsub.s32 %v1414_v24, %v332_v21 }
   0x7   :  { %s5774_s24 = sld [smem:[#allocation44_spill]]  ;;  %s5778_s25 = sld [smem:[#allocation45_spill]] }
   0x8   :  { %v70_v0 = vld [vmem:[%s5770_s26] sm:$0xff]  ;;  %s3886_s26 = smov 120   ;;  %s3889_s0 = smov 8  }
   0x9   :  { %v68_v1 = vld [vmem:[%s5771_s28] sm:$0xff]  ;;  %v69_v2 = vld [vmem:[%s5771_s28 + $0x8] sm:$0xff]  ;;  %3574 = vmatprep.subr.mxu0 %v70_v0 }
   0xa   :  { %3576 = vmatprep.mubr.msk.f32.mxu0 %vm78_vm0, %v68_v1  ;;  %3575 = vmatpush3.msra.mxu0 %v70_v0 }
   0xb   :  { %v246_v5 = vld [vmem:[%s5773_s5] sm:$0xff]  ;;  %v247_v7 = vld [vmem:[%s5773_s5 + $0x8] sm:$0xff]  ;;  %3577 = vmatmul.mubr.msk.f32.vlgmr.msra.gmra.mrb[0].mxu0 %vm78_vm0, %v69_v2  ;;  %v248_v11 = vld [vmem:[%s5773_s5 + $0x10] sm:$0xff] }
   0xc   :  { %v160_v3 = vld [vmem:[%s5772_s7] sm:$0xff]  ;;  %v161_v4 = vld [vmem:[%s5772_s7 + $0x8] sm:$0xff]  ;;  %v3725_v8 = vpack.c.bf16 %v247_v7, %v246_v5  ;;  %v162_v9 = vld [vmem:[%s5772_s7 + $0x10] sm:$0xff] }
   0xd   :  { %v3717_v6 = vpack.c.bf16 %v161_v4, %v160_v3  ;;  %v163_v10 = vld [vmem:[%s5772_s7 + $0x18] sm:$0xff]  ;;  %v3454_v15 = vld [vmem:[%s5774_s24] ss:$0 sm:$0xff] }
   0xe   :  { %3726 = vmatprep.subr.bf16.mxu0 %v3725_v8  ;;  %v3721_v12 = vpack.c.bf16 %v163_v10, %v162_v9  ;;  %v249_v13 = vld [vmem:[%s5773_s5 + $0x18] sm:$0xff] }
   0xf   :  { %3718 = vmatprep.subr.bf16.mxu1 %v3717_v6  ;;  %3728 = vmatpush3.bf16.msra.mxu0 %v3725_v8  ;;  %v3729_v14 = vpack.c.bf16 %v249_v13, %v248_v11 }
  0x10   :  { %3720 = vmatpush3.bf16.msra.mxu1 %v3717_v6 }
  0x11   :  { %3722 = vmatprep.subr.bf16.mxu1 %v3721_v12  ;;  %3730 = vmatprep.subr.bf16.mxu0 %v3729_v14 }
  0x13   :  { %3732 = vmatpush3.bf16.msra.mxu0 %v3729_v14 }
  0x14   :  { %3724 = vmatpush3.bf16.msra.mxu1 %v3721_v12 }
  0xde   :  { %v3578_v16 = vpop.f32.mrb[0].mxu0 }
  0xdf   :  { %v151_v17 = vpop.f32.mrb[1].mxu0  ;;  %v4042_v19 = vadd.f32 %v3578_v16, %v3454_v15 }
  0xe0   :  { %v4040_v18 = vadd.f32 %v3454_v15, %v151_v17 }
  0xe1   :  { %5776 = vst [vmem:[#allocation3_spill] sm:$0xff] %v4042_v19 }
  0xe2   :  { %5775 = vst [vmem:[#allocation2_spill] sm:$0xff] %v4040_v18  ;;  %3587 = vmatprep.mubr.msk.f32.mxu1 %vm164_vm1, %v4040_v18  ;;  %3598 = vmatprep.mubr.msk.f32.mxu0 %vm164_vm1, %v4040_v18 }
  0xe3   :  { %3588 = vmatmul.mubr.msk.f32.vlgmr.msra.gmra.mrb[0].mxu1 %vm164_vm1, %v4042_v19  ;;  %3599 = vmatmul.mubr.msk.f32.vlgmr.msra.gmra.mrb[2].mxu0 %vm164_vm1, %v4042_v19 }
 0x1b6   :  { %v4056_v30 = vpop.f32.mrb[0].mxu1  ;;  %v3600_v31 = vpop.f32.mrb[2].mxu0 }
 0x1b7   :  { %v376_v32 = vcombine.high %v3600_v31, %v3600_v31  ;;  %v383_v33 = vrot.slane %v3600_v31, %v333_v29  ;;  %v4058_v35 = vpop.f32.mrb[1].mxu1  ;;  %v316_v36 = vpop.f32.mrb[3].mxu0 }
 0x1b8   :  { %v327_v37 = vcombine.high %v316_v36, %v316_v36  ;;  %v334_v38 = vrot.slane %v316_v36, %v333_v29  ;;  %v3733_v39 = vpack.c.bf16 %v4056_v30, %v4058_v35  ;;  %v4064_v40 = vpack.i.bf16 %v4056_v30, %v4058_v35 }
 0x1b9   :  { %v390_v41 = vrot.slane %v376_v32, %v333_v29  ;;  %v391_v42 = vcombine.high %v383_v33, %v383_v33  ;;  %v399_v43 = vrot.slane %v383_v33, %v333_v29 }
 0x1ba   :  { %5777 = vst [vmem:[#allocation4_spill] sm:$0xff] %v4064_v40  ;;  %v341_v44 = vrot.slane %v327_v37, %v333_v29  ;;  %v342_v45 = vcombine.high %v334_v38, %v334_v38  ;;  %v350_v46 = vrot.slane %v334_v38, %v333_v29  ;;  %3734 = vmatprep.subr.bf16.mxu1 %v3733_v39 }
 0x1bb   :  { %v392_v47 = vcombine.high %v390_v41, %v390_v41  ;;  %v406_v48 = vrot.slane %v390_v41, %v333_v29  ;;  %v413_v49 = vrot.slane %v391_v42, %v333_v29  ;;  %v421_v50 = vcombine.high %v399_v43, %v399_v43  ;;  %3736 = vmatpush3.bf16.msra.mxu1 %v3733_v39 }
 0x1bc   :  { %v460_v51 = vrot.slane %v399_v43, %v427_v34  ;;  %v343_v52 = vcombine.high %v341_v44, %v341_v44  ;;  %v357_v53 = vrot.slane %v341_v44, %v333_v29  ;;  %v364_v54 = vrot.slane %v342_v45, %v333_v29  ;;  %v4142_v44 = vld [vmem:[%s5778_s25] ss:$0 sm:$0xff] }
 0x1bd   :  { %v420_v55 = vrot.slane %v392_v47, %v333_v29  ;;  %v422_v56 = vcombine.high %v406_v48, %v406_v48  ;;  %v423_v57 = vcombine.high %v413_v49, %v413_v49  ;;  %v4066_v58 = vrot.slane %v413_v49, %v427_v34 }
 0x1be   :  { %v4068_v59 = vrot.slane %v421_v50, %v427_v34  ;;  %v4070_v60 = vrot.slane %v406_v48, %v427_v34  ;;  %v522_v61 = vadd.f32 %v4056_v30, %v460_v51  ;;  %v371_v62 = vrot.slane %v343_v52, %v333_v29 }
 0x1bf   :  { %v424_v63 = vcombine.high %v420_v55, %v420_v55  ;;  %v4073_v0 = vrot.slane %v423_v57, %v427_v34  ;;  %v4075_v1 = vrot.slane %v420_v55, %v427_v34  ;;  %v4077_v2 = vrot.slane %v422_v56, %v427_v34 }
 0x1c0   :  { %v524_v3 = vadd.f32 %v4056_v30, %v4066_v58  ;;  %v526_v4 = vadd.f32 %v4056_v30, %v4068_v59  ;;  %v530_v5 = vadd.f32 %v4056_v30, %v4070_v60  ;;  %v586_v6 = vmul.f32 0.2, %v522_v61 }
 0x1c1   :  { %v4085_v7 = vrot.slane %v424_v63, %v427_v34  ;;  %v4089_v8 = vadd.f32 %v4056_v30, %v4073_v0  ;;  %v4093_v9 = vadd.f32 %v4056_v30, %v4075_v1  ;;  %v4097_v10 = vadd.f32 %v4056_v30, %v4077_v2 }
 0x1c2   :  { %v372_v11 = vcombine.high %v350_v46, %v350_v46  ;;  %v373_v12 = vcombine.high %v357_v53, %v357_v53  ;;  %v374_v13 = vcombine.high %v364_v54, %v364_v54  ;;  %v375_v14 = vcombine.high %v371_v62, %v371_v62 }
 0x1c3   :  { %v428_v15 = vrot.slane %v350_v46, %v427_v34  ;;  %v432_v16 = vrot.slane %v364_v54, %v427_v34  ;;  %v444_v17 = vrot.slane %v357_v53, %v427_v34  ;;  %v448_v20 = vrot.slane %v371_v62, %v427_v34 }
 0x1c4   :  { %v436_v21 = vrot.slane %v372_v11, %v427_v34  ;;  %v440_v22 = vrot.slane %v374_v13, %v427_v34  ;;  %v452_v24 = vrot.slane %v373_v12, %v427_v34  ;;  %v4099_v26 = vrot.slane %v375_v14, %v427_v34 }
 0x1c5   :  { %v505_v27 = vadd.f32 %v428_v15, %v4058_v35  ;;  %v506_v28 = vadd.f32 %v4056_v30, %v428_v15  ;;  %v4104_v29 = vadd.f32 %v432_v16, %v4058_v35  ;;  %v4107_v31 = vadd.f32 %v4056_v30, %v432_v16 }
 0x1c6   :  { %v4110_v32 = vadd.f32 %v436_v21, %v4058_v35  ;;  %v4113_v33 = vadd.f32 %v4056_v30, %v436_v21  ;;  %v4116_v36 = vadd.f32 %v440_v22, %v4058_v35  ;;  %v4119_v34 = vadd.f32 %v4056_v30, %v440_v22 }
 0x1c7   :  { %v4122_v37 = vadd.f32 %v444_v17, %v4058_v35  ;;  %v4125_v38 = vadd.f32 %v4056_v30, %v444_v17  ;;  %v4128_v39 = vadd.f32 %v448_v20, %v4058_v35  ;;  %v4131_v41 = vadd.f32 %v4056_v30, %v448_v20 }
 0x1c8   :  { %v4134_v42 = vadd.f32 %v452_v24, %v4058_v35  ;;  %v4137_v43 = vadd.f32 %v4056_v30, %v452_v24  ;;  %v570_v45 = vmul.f32 0.2, %v506_v28  ;;  %vm554_vm2 = vcmp.ge.f32.partialorder %v522_v61, 0.0 }
 0x1c9   :  { %v521_v46 = vadd.f32 %v460_v51, %v4058_v35  ;;  %v569_v47 = vmul.f32 0.2, %v505_v27  ;;  %v618_v48 = vsel %vm554_vm2, %v522_v61, %v586_v6  ;;  %vm538_vm3 = vcmp.ge.f32.partialorder %v506_v28, 0.0 }
 0x1ca   :  { %v4146_v49 = vmul.f32 %v4142_v44, %v618_v48  ;;  %vm556_vm5 = vcmp.ge.f32.partialorder %v524_v3, 0.0  ;;  %vm537_vm6 = vcmp.ge.f32.partialorder %v505_v27, 0.0  ;;  %v588_v52 = vmul.f32 0.2, %v524_v3 }
 0x1cb   :  { %vm553_vm4 = vcmp.ge.f32.partialorder %v521_v46, 0.0  ;;  %v585_v50 = vmul.f32 0.2, %v521_v46  ;;  %vm558_vm7 = vcmp.ge.f32.partialorder %v526_v4, 0.0  ;;  %v590_v53 = vmul.f32 0.2, %v526_v4 }
 0x1cc   :  { %834 = vrot.lane.b32.xlu1 %v4146_v49, %s3886_s26  ;;  %v602_v55 = vsel %vm538_vm3, %v506_v28, %v570_v45  ;;  %vm562_vm8 = vcmp.ge.f32.partialorder %v530_v5, 0.0  ;;  %v594_v51 = vmul.f32 0.2, %v530_v5  ;;  %v620_v57 = vsel %vm556_vm5, %v524_v3, %v588_v52 }
 0x1cd   :  { %v617_v54 = vsel %vm553_vm4, %v521_v46, %v585_v50  ;;  %v622_v61 = vsel %vm558_vm7, %v526_v4, %v590_v53  ;;  %v523_v62 = vadd.f32 %v4066_v58, %v4058_v35  ;;  %v4156_v63 = vmul.f32 %v4142_v44, %v620_v57 }
 0x1ce   :  { %v4151_v56 = vmul.f32 %v4142_v44, %v617_v54  ;;  %v4159_v6 = vmul.f32 %v4142_v44, %v622_v61  ;;  %v626_v11 = vsel %vm562_vm8, %v530_v5, %v594_v51  ;;  %v525_v12 = vadd.f32 %v4068_v59, %v4058_v35 }
 0x1cf   :  { %v4166_v13 = vmul.f32 %v4142_v44, %v626_v11  ;;  %vm555_vm9 = vcmp.ge.f32.partialorder %v523_v62, 0.0  ;;  %v587_v3 = vmul.f32 0.2, %v523_v62  ;;  %v601_v58 = vsel %vm537_vm6, %v505_v27, %v569_v47 }
 0x1d0   :  { %832 = vrot.lane.b32.xlu0 %v4151_v56, %s3886_s26  ;;  %1026 = vrot.lane.b32.xlu1 %v4146_v49, %s3887_s27  ;;  %vm557_vm10 = vcmp.ge.f32.partialorder %v525_v12, 0.0  ;;  %v589_v4 = vmul.f32 0.2, %v525_v12  ;;  %v529_v5 = vadd.f32 %v4070_v60, %v4058_v35  ;;  %v4174_v59 = vmul.f32 %v4142_v44, %v602_v55 }
 0x1d1   :  { %v619_v14 = vsel %vm555_vm9, %v523_v62, %v587_v3  ;;  %vm539_vm11 = vcmp.ge.f32.partialorder %v4104_v29, 0.0  ;;  %v571_v15 = vmul.f32 0.2, %v4104_v29  ;;  %vm540_vm13 = vcmp.ge.f32.partialorder %v4107_v31, 0.0 }
 0x1d2   :  { %v4179_v16 = vmul.f32 %v4142_v44, %v619_v14  ;;  %v621_v17 = vsel %vm557_vm10, %v525_v12, %v589_v4  ;;  %vm561_vm12 = vcmp.ge.f32.partialorder %v529_v5, 0.0  ;;  %v593_v20 = vmul.f32 0.2, %v529_v5 }
 0x1d3   :  { %v4184_v21 = vmul.f32 %v4142_v44, %v621_v17  ;;  %v603_v60 = vsel %vm539_vm11, %v4104_v29, %v571_v15  ;;  %v572_v22 = vmul.f32 0.2, %v4107_v31  ;;  %vm542_vm14 = vcmp.ge.f32.partialorder %v4113_v33, 0.0 }
 0x1d4   :  { %1024 = vrot.lane.b32.xlu0 %v4151_v56, %s3887_s27  ;;  %1218 = vrot.lane.b32.xlu1 %v4146_v49, %s3888_s6  ;;  %v625_v24 = vsel %vm561_vm12, %v529_v5, %v593_v20  ;;  %v4192_v27 = vmul.f32 %v4142_v44, %v603_v60  ;;  %v574_v28 = vmul.f32 0.2, %v4113_v33  ;;  %vm541_vm15 = vcmp.ge.f32.partialorder %v4110_v32, 0.0 }
 0x1d5   :  { %v4197_v45 = vmul.f32 %v4142_v44, %v625_v24  ;;  %v604_v29 = vsel %vm540_vm13, %v4107_v31, %v572_v22  ;;  %v573_v46 = vmul.f32 0.2, %v4110_v32  ;;  %vm546_vm2 = vcmp.ge.f32.partialorder %v4125_v38, 0.0 }
 0x1d6   :  { %v4203_v47 = vmul.f32 %v4142_v44, %v604_v29  ;;  %v606_v48 = vsel %vm542_vm14, %v4113_v33, %v574_v28  ;;  %v578_v50 = vmul.f32 0.2, %v4125_v38  ;;  %vm545_vm3 = vcmp.ge.f32.partialorder %v4122_v37, 0.0 }
 0x1d7   :  { %v4211_v52 = vmul.f32 %v4142_v44, %v606_v48  ;;  %v605_v31 = vsel %vm541_vm15, %v4110_v32, %v573_v46  ;;  %v577_v53 = vmul.f32 0.2, %v4122_v37  ;;  %v4223_v55 = vmul.f32 %v4142_v44, %v601_v58 }
 0x1d8   :  { %1216 = vrot.lane.b32.xlu0 %v4151_v56, %s3888_s6  ;;  %994 = vrot.lane.b32.xlu1 %v4174_v59, %s3887_s27  ;;  %v4219_v33 = vmul.f32 %v4142_v44, %v605_v31  ;;  %v610_v54 = vsel %vm546_vm2, %v4125_v38, %v578_v50  ;;  %vm560_vm4 = vcmp.ge.f32.partialorder %v4089_v8, 0.0  ;;  %v592_v61 = vmul.f32 0.2, %v4089_v8 }
 0x1d9   :  { %v4226_v51 = vmul.f32 %v4142_v44, %v610_v54  ;;  %v609_v32 = vsel %vm545_vm3, %v4122_v37, %v577_v53  ;;  %v527_v38 = vadd.f32 %v4073_v0, %v4058_v35  ;;  %vm564_vm5 = vcmp.ge.f32.partialorder %v4093_v9, 0.0 }
 0x1da   :  { %v4230_v57 = vmul.f32 %v4142_v44, %v609_v32  ;;  %v596_v62 = vmul.f32 0.2, %v4093_v9  ;;  %v531_v37 = vadd.f32 %v4075_v1, %v4058_v35  ;;  %vm566_vm6 = vcmp.ge.f32.partialorder %v4097_v10, 0.0 }
 0x1db   :  { %v598_v11 = vmul.f32 0.2, %v4097_v10  ;;  %v533_v12 = vadd.f32 %v4077_v2, %v4058_v35  ;;  %v624_v3 = vsel %vm560_vm4, %v4089_v8, %v592_v61  ;;  %vm559_vm7 = vcmp.ge.f32.partialorder %v527_v38, 0.0 }
 0x1dc   :  { %800 = vrot.lane.b32.xlu0 %v4223_v55, %s3886_s26  ;;  %1186 = vrot.lane.b32.xlu1 %v4174_v59, %s3888_s6  ;;  %v591_v0 = vmul.f32 0.2, %v527_v38  ;;  %v628_v58 = vsel %vm564_vm5, %v4093_v9, %v596_v62  ;;  %v4251_v4 = vmul.f32 %v4142_v44, %v624_v3  ;;  %vm563_vm8 = vcmp.ge.f32.partialorder %v531_v37, 0.0 }
 0x1dd   :  { %v4254_v5 = vmul.f32 %v4142_v44, %v628_v58  ;;  %v595_v1 = vmul.f32 0.2, %v531_v37  ;;  %v630_v2 = vsel %vm566_vm6, %v4097_v10, %v598_v11  ;;  %vm565_vm9 = vcmp.ge.f32.partialorder %v533_v12, 0.0 }
 0x1de   :  { %v623_v14 = vsel %vm559_vm7, %v527_v38, %v591_v0  ;;  %v597_v8 = vmul.f32 0.2, %v533_v12  ;;  %v4263_v17 = vmul.f32 %v4142_v44, %v630_v2  ;;  %vm544_vm10 = vcmp.ge.f32.partialorder %v4119_v34, 0.0 }
 0x1df   :  { %v4260_v15 = vmul.f32 %v4142_v44, %v623_v14  ;;  %v627_v9 = vsel %vm563_vm8, %v531_v37, %v595_v1  ;;  %v576_v10 = vmul.f32 0.2, %v4119_v34  ;;  %vm548_vm11 = vcmp.ge.f32.partialorder %v4131_v41, 0.0 }
 0x1e0   :  { %802 = vrot.lane.b32.xlu0 %v4174_v59, %s3886_s26  ;;  %v4266_v20 = vmul.f32 %v4142_v44, %v627_v9  ;;  %v629_v60 = vsel %vm565_vm9, %v533_v12, %v597_v8  ;;  %v580_v24 = vmul.f32 0.2, %v4131_v41  ;;  %vm550_vm12 = vcmp.ge.f32.partialorder %v4137_v43, 0.0 }
 0x1e1   :  { %v4269_v22 = vmul.f32 %v4142_v44, %v629_v60  ;;  %v582_v28 = vmul.f32 0.2, %v4137_v43  ;;  %vm543_vm13 = vcmp.ge.f32.partialorder %v4116_v36, 0.0  ;;  %v575_v29 = vmul.f32 0.2, %v4116_v36 }
 0x1e2   :  { %v608_v46 = vsel %vm544_vm10, %v4119_v34, %v576_v10  ;;  %v612_v48 = vsel %vm548_vm11, %v4131_v41, %v580_v24  ;;  %vm547_vm14 = vcmp.ge.f32.partialorder %v4128_v39, 0.0  ;;  %v579_v50 = vmul.f32 0.2, %v4128_v39 }
 0x1e3   :  { %v4286_v31 = vmul.f32 %v4142_v44, %v608_v46  ;;  %v4289_v53 = vmul.f32 %v4142_v44, %v612_v48  ;;  %v614_v54 = vsel %vm550_vm12, %v4137_v43, %v582_v28  ;;  %v607_v32 = vsel %vm543_vm13, %v4116_v36, %v575_v29 }
 0x1e4   :  { %992 = vrot.lane.b32.xlu0 %v4223_v55, %s3887_s27  ;;  %v4296_v34 = vmul.f32 %v4142_v44, %v614_v54  ;;  %v4299_v41 = vmul.f32 %v4142_v44, %v607_v32  ;;  %v611_v61 = vsel %vm547_vm14, %v4128_v39, %v579_v50  ;;  %vm549_vm15 = vcmp.ge.f32.partialorder %v4134_v42, 0.0 }
 0x1e5   :  { %v4304_v38 = vmul.f32 %v4142_v44, %v611_v61  ;;  %v581_v43 = vmul.f32 0.2, %v4134_v42  ;;  %v536_v62 = vadd.f32 %v4056_v30, %v4085_v7  ;;  %v535_v37 = vadd.f32 %v4085_v7, %v4058_v35 }
 0x1e6   :  { %v520_v3 = vadd.f32 %v4056_v30, %v4099_v26  ;;  %v519_v0 = vadd.f32 %v4099_v26, %v4058_v35  ;;  %v720_v35 = vsel %vm78_vm0, %v4151_v56, 0.0  ;;  %v723_v26 = vsel %vm78_vm0, %v4146_v49, 0.0 }
 0x1e7   :  { %v613_v36 = vsel %vm549_vm15, %v4134_v42, %v581_v43  ;;  %vm568_vm2 = vcmp.ge.f32.partialorder %v536_v62, 0.0  ;;  %v600_v39 = vmul.f32 0.2, %v536_v62  ;;  %vm567_vm3 = vcmp.ge.f32.partialorder %v535_v37, 0.0 }
 0x1e8   :  { %1184 = vrot.lane.b32.xlu0 %v4223_v55, %s3888_s6  ;;  %v4313_v11 = vmul.f32 %v4142_v44, %v613_v36  ;;  %v599_v12 = vmul.f32 0.2, %v535_v37  ;;  %vm552_vm4 = vcmp.ge.f32.partialorder %v520_v3, 0.0  ;;  %v584_v14 = vmul.f32 0.2, %v520_v3 }
 0x1e9   :  { %v632_v42 = vsel %vm568_vm2, %v536_v62, %v600_v39  ;;  %vm551_vm5 = vcmp.ge.f32.partialorder %v519_v0, 0.0  ;;  %v583_v2 = vmul.f32 0.2, %v519_v0  ;;  %v672_v49 = vsel %vm78_vm0, %v4223_v55, 0.0 }
 0x1ea   :  { %v631_v58 = vsel %vm567_vm3, %v535_v37, %v599_v12  ;;  %v4320_v1 = vmul.f32 %v4142_v44, %v632_v42  ;;  %v616_v8 = vsel %vm552_vm4, %v520_v3, %v584_v14  ;;  %v729_v56 = vsel %vm78_vm0, %v4156_v63, 0.0 }
 0x1eb   :  { %v4323_v7 = vmul.f32 %v4142_v44, %v631_v58  ;;  %v4326_v9 = vmul.f32 %v4142_v44, %v616_v8  ;;  %v615_v30 = vsel %vm551_vm5, %v519_v0, %v583_v2  ;;  %v735_v55 = vsel %vm78_vm0, %v4159_v6, 0.0  ;;  %vm3806_vm5 = vmpackc.low %vm78_vm0, %vm78_vm0 }
 0x1ec   :  { %v4329_v60 = vmul.f32 %v4142_v44, %v615_v30  ;;  %v675_v44 = vsel %vm78_vm0, %v4174_v59, 0.0  ;;  %v726_v59 = vsel %vm78_vm0, %v4179_v16, 0.0  ;;  %v732_v10 = vsel %vm78_vm0, %v4184_v21, 0.0 }
 0x1ed   :  { %v747_v24 = vsel %vm78_vm0, %v4166_v13, 0.0  ;;  %v678_v46 = vsel %vm78_vm0, %v4192_v27, 0.0  ;;  %v684_v50 = vsel %vm78_vm0, %v4219_v33, 0.0  ;;  %v681_v32 = vsel %vm78_vm0, %v4203_v47, 0.0 }
 0x1ee   :  { %v696_v61 = vsel %vm78_vm0, %v4230_v57, 0.0  ;;  %v741_v18 = vsel %vm78_vm0, %v4251_v4, 0.0  ;;  %v756_v19 = vsel %vm78_vm0, %v4269_v22, 0.0  ;;  %vm1419_vm6 = vcmask 130112  }
 0x1ef   :  { %vm1556_vm7 = vcmask 1041409   ;;  %vm1558_vm8 = vcmask 1042434   ;;  %vm1560_vm9 = vcmask 1043459   ;;  %vm1562_vm10 = vcmask 1044484  }
 0x1f0   :  { %vm1564_vm11 = vcmask 1045509   ;;  %vm1566_vm12 = vcmask 1046534   ;;  %vm1568_vm13 = vcmask 1047559   ;;  %vm2167_vm15 = vcmask 130048  }
 0x1f1   :  { %vm2628_vm3 = vcmask 195584   ;;  %vm2879_vm4 = vcmask 523264  }
 0x200   :  { %721 = vadd.xlane.f32.xlu1 %v720_v35 }
 0x207   :  { %724 = vadd.xlane.f32.xlu0 %v723_v26 }
 0x211   :  { %838 = vrot.lane.b32.xlu1 %v4156_v63, %s3886_s26 }
 0x215   :  { %842 = vrot.lane.b32.xlu1 %v4159_v6, %s3886_s26 }
 0x219   :  { %850 = vrot.lane.b32.xlu1 %v4166_v13, %s3886_s26 }
 0x21d   :  { %836 = vrot.lane.b32.xlu0 %v4179_v16, %s3886_s26  ;;  %1030 = vrot.lane.b32.xlu1 %v4156_v63, %s3887_s27 }
 0x221   :  { %840 = vrot.lane.b32.xlu0 %v4184_v21, %s3886_s26  ;;  %1034 = vrot.lane.b32.xlu1 %v4159_v6, %s3887_s27 }
 0x225   :  { %848 = vrot.lane.b32.xlu0 %v4197_v45, %s3886_s26  ;;  %1222 = vrot.lane.b32.xlu1 %v4156_v63, %s3888_s6  ;;  %v744_v63 = vsel %vm78_vm0, %v4197_v45, 0.0 }
 0x229   :  { %1028 = vrot.lane.b32.xlu0 %v4179_v16, %s3887_s27  ;;  %1226 = vrot.lane.b32.xlu1 %v4159_v6, %s3888_s6 }
 0x22d   :  { %1032 = vrot.lane.b32.xlu0 %v4184_v21, %s3887_s27  ;;  %1042 = vrot.lane.b32.xlu1 %v4166_v13, %s3887_s27 }
 0x231   :  { %1220 = vrot.lane.b32.xlu0 %v4179_v16, %s3888_s6  ;;  %1234 = vrot.lane.b32.xlu1 %v4166_v13, %s3888_s6 }
 0x235   :  { %1224 = vrot.lane.b32.xlu0 %v4184_v21, %s3888_s6 }
 0x239   :  { %1040 = vrot.lane.b32.xlu0 %v4197_v45, %s3887_s27 }
 0x23d   :  { %1232 = vrot.lane.b32.xlu0 %v4197_v45, %s3888_s6 }
 0x23e   :  { %v4463_v16 = vpop.permute.xlu1 %834 }
 0x242   :  { %v4459_v6 = vpop.permute.xlu0 %832  ;;  %v4467_v45 = vpop.permute.xlu1 %1026 }
 0x246   :  { %v4461_v13 = vpop.permute.xlu0 %1024  ;;  %v4471_v29 = vpop.permute.xlu1 %1218 }
 0x24a   :  { %v4465_v21 = vpop.permute.xlu0 %1216  ;;  %v4479_v54 = vpop.permute.xlu1 %994 }
 0x24e   :  { %v4469_v28 = vpop.permute.xlu0 %800  ;;  %v4489_v36 = vpop.permute.xlu1 %1186 }
 0x252   :  { %v4475_v48 = vpop.permute.xlu0 %802 }
 0x255   :  { %676 = vadd.xlane.f32.xlu1 %v675_v44 }
 0x256   :  { %v4485_v43 = vpop.permute.xlu0 %992 }
 0x25a   :  { %v4493_v62 = vpop.permute.xlu0 %1184 }
 0x25c   :  { %673 = vadd.xlane.f32.xlu0 %v672_v49 }
 0x266   :  { %804 = vrot.lane.b32.xlu1 %v4192_v27, %s3886_s26 }
 0x26a   :  { %806 = vrot.lane.b32.xlu1 %v4203_v47, %s3886_s26 }
 0x26e   :  { %810 = vrot.lane.b32.xlu1 %v4211_v52, %s3886_s26 }
 0x272   :  { %808 = vrot.lane.b32.xlu0 %v4219_v33, %s3886_s26  ;;  %818 = vrot.lane.b32.xlu1 %v4226_v51, %s3886_s26 }
 0x276   :  { %816 = vrot.lane.b32.xlu0 %v4230_v57, %s3886_s26  ;;  %998 = vrot.lane.b32.xlu1 %v4203_v47, %s3887_s27 }
 0x27a   :  { %996 = vrot.lane.b32.xlu0 %v4192_v27, %s3887_s27  ;;  %1002 = vrot.lane.b32.xlu1 %v4211_v52, %s3887_s27 }
 0x27e   :  { %1000 = vrot.lane.b32.xlu0 %v4219_v33, %s3887_s27  ;;  %1190 = vrot.lane.b32.xlu1 %v4203_v47, %s3888_s6 }
 0x282   :  { %1188 = vrot.lane.b32.xlu0 %v4192_v27, %s3888_s6  ;;  %1194 = vrot.lane.b32.xlu1 %v4211_v52, %s3888_s6  ;;  %v687_v27 = vsel %vm78_vm0, %v4211_v52, 0.0 }
 0x286   :  { %1192 = vrot.lane.b32.xlu0 %v4219_v33, %s3888_s6  ;;  %1010 = vrot.lane.b32.xlu1 %v4226_v51, %s3887_s27  ;;  %v699_v33 = vsel %vm78_vm0, %v4226_v51, 0.0 }
 0x28a   :  { %1008 = vrot.lane.b32.xlu0 %v4230_v57, %s3887_s27  ;;  %1202 = vrot.lane.b32.xlu1 %v4226_v51, %s3888_s6 }
 0x28d   :  { %v4495_v47 = vpop.xlane.xlu1 %721 }
 0x28e   :  { %1200 = vrot.lane.b32.xlu0 %v4230_v57, %s3888_s6  ;;  %5779 = vst [vmem:[#allocation5_spill] sm:$0xff] %v4495_v47 }
 0x291   :  { %v4499_v57 = vpop.permute.xlu1 %838 }
 0x294   :  { %v4497_v37 = vpop.xlane.xlu0 %724 }
 0x295   :  { %5780 = vst [vmem:[#allocation6_spill] sm:$0xff] %v4497_v37  ;;  %v4505_v52 = vpop.permute.xlu1 %842 }
 0x298   :  { %v4501_v39 = vpop.permute.xlu0 %836 }
 0x299   :  { %v4511_v12 = vpop.permute.xlu1 %850 }
 0x29c   :  { %v4509_v51 = vpop.permute.xlu0 %840 }
 0x29d   :  { %v4521_v0 = vpop.permute.xlu1 %1030 }
 0x2a0   :  { %v4517_v3 = vpop.permute.xlu0 %848 }
 0x2a1   :  { %v4531_v58 = vpop.permute.xlu1 %1034 }
 0x2a4   :  { %v4527_v42 = vpop.permute.xlu0 %1028 }
 0x2a5   :  { %v4541_v2 = vpop.permute.xlu1 %1222 }
 0x2a8   :  { %v4537_v14 = vpop.permute.xlu0 %1032 }
 0x2a9   :  { %v4551_v30 = vpop.permute.xlu1 %1226 }
 0x2ac   :  { %v4547_v8 = vpop.permute.xlu0 %1220 }
 0x2ad   :  { %730 = vadd.xlane.f32.xlu0 %v729_v56  ;;  %v4559_v26 = vpop.permute.xlu1 %1042 }
 0x2ae   :  { %727 = vadd.xlane.f32.xlu1 %v726_v59 }
 0x2b0   :  { %v4557_v35 = vpop.permute.xlu0 %1224 }
 0x2b1   :  { %736 = vadd.xlane.f32.xlu0 %v735_v55  ;;  %v4567_v49 = vpop.permute.xlu1 %1234 }
 0x2b2   :  { %733 = vadd.xlane.f32.xlu1 %v732_v10 }
 0x2b4   :  { %v4563_v44 = vpop.permute.xlu0 %1040 }
 0x2b5   :  { %748 = vadd.xlane.f32.xlu0 %v747_v24 }
 0x2b6   :  { %745 = vadd.xlane.f32.xlu1 %v744_v63 }
 0x2b8   :  { %v4569_v56 = vpop.permute.xlu0 %1232 }
 0x2c7   :  { %846 = vrot.lane.b32.xlu1 %v4251_v4, %s3886_s26 }
 0x2cb   :  { %844 = vrot.lane.b32.xlu0 %v4260_v15, %s3886_s26  ;;  %854 = vrot.lane.b32.xlu1 %v4254_v5, %s3886_s26 }
 0x2cf   :  { %852 = vrot.lane.b32.xlu0 %v4266_v20, %s3886_s26  ;;  %858 = vrot.lane.b32.xlu1 %v4263_v17, %s3886_s26 }
 0x2d3   :  { %856 = vrot.lane.b32.xlu0 %v4269_v22, %s3886_s26  ;;  %1038 = vrot.lane.b32.xlu1 %v4251_v4, %s3887_s27 }
 0x2d7   :  { %1036 = vrot.lane.b32.xlu0 %v4260_v15, %s3887_s27  ;;  %1230 = vrot.lane.b32.xlu1 %v4251_v4, %s3888_s6 }
 0x2db   :  { %1228 = vrot.lane.b32.xlu0 %v4260_v15, %s3888_s6  ;;  %1046 = vrot.lane.b32.xlu1 %v4254_v5, %s3887_s27 }
 0x2df   :  { %1044 = vrot.lane.b32.xlu0 %v4266_v20, %s3887_s27  ;;  %1050 = vrot.lane.b32.xlu1 %v4263_v17, %s3887_s27 }
 0x2e2   :  { %v4571_v59 = vpop.xlane.xlu1 %676 }
 0x2e3   :  { %1048 = vrot.lane.b32.xlu0 %v4269_v22, %s3887_s27  ;;  %1238 = vrot.lane.b32.xlu1 %v4254_v5, %s3888_s6 }
 0x2e6   :  { %v4575_v10 = vpop.permute.xlu1 %804 }
 0x2e7   :  { %1236 = vrot.lane.b32.xlu0 %v4266_v20, %s3888_s6  ;;  %1242 = vrot.lane.b32.xlu1 %v4263_v17, %s3888_s6 }
 0x2e9   :  { %v4573_v55 = vpop.xlane.xlu0 %673 }
 0x2ea   :  { %v4579_v63 = vpop.permute.xlu1 %806 }
 0x2eb   :  { %1240 = vrot.lane.b32.xlu0 %v4269_v22, %s3888_s6 }
 0x2ed   :  { %v4577_v24 = vpop.permute.xlu0 %808 }
 0x30a   :  { %679 = vadd.xlane.f32.xlu0 %v678_v46  ;;  %v4581_v46 = vpop.permute.xlu0 %816 }
 0x30b   :  { %685 = vadd.xlane.f32.xlu1 %v684_v50  ;;  %v4583_v50 = vpop.permute.xlu1 %810 }
 0x30e   :  { %682 = vadd.xlane.f32.xlu0 %v681_v32  ;;  %v738_v32 = vsel %vm78_vm0, %v4260_v15, 0.0  ;;  %v753_v15 = vsel %vm78_vm0, %v4254_v5, 0.0 }
 0x30f   :  { %697 = vadd.xlane.f32.xlu1 %v696_v61  ;;  %v4587_v61 = vpop.permute.xlu0 %996 }
 0x312   :  { %688 = vadd.xlane.f32.xlu0 %v687_v27  ;;  %v750_v27 = vsel %vm78_vm0, %v4266_v20, 0.0  ;;  %v759_v20 = vsel %vm78_vm0, %v4263_v17, 0.0 }
 0x313   :  { %v4597_v40 = vpop.permute.xlu0 %1000 }
 0x316   :  { %700 = vadd.xlane.f32.xlu0 %v699_v33  ;;  %v4591_v33 = vpop.permute.xlu1 %818 }
 0x320   :  { %814 = vrot.lane.b32.xlu1 %v4286_v31, %s3886_s26 }
 0x324   :  { %822 = vrot.lane.b32.xlu1 %v4289_v53, %s3886_s26 }
 0x328   :  { %826 = vrot.lane.b32.xlu1 %v4296_v34, %s3886_s26 }
 0x32c   :  { %812 = vrot.lane.b32.xlu0 %v4299_v41, %s3886_s26  ;;  %1006 = vrot.lane.b32.xlu1 %v4286_v31, %s3887_s27 }
 0x330   :  { %820 = vrot.lane.b32.xlu0 %v4304_v38, %s3886_s26  ;;  %1198 = vrot.lane.b32.xlu1 %v4286_v31, %s3888_s6 }
 0x334   :  { %824 = vrot.lane.b32.xlu0 %v4313_v11, %s3886_s26  ;;  %1014 = vrot.lane.b32.xlu1 %v4289_v53, %s3887_s27 }
 0x338   :  { %1004 = vrot.lane.b32.xlu0 %v4299_v41, %s3887_s27  ;;  %1018 = vrot.lane.b32.xlu1 %v4296_v34, %s3887_s27 }
 0x33c   :  { %1196 = vrot.lane.b32.xlu0 %v4299_v41, %s3888_s6  ;;  %1206 = vrot.lane.b32.xlu1 %v4289_v53, %s3888_s6 }
 0x340   :  { %1012 = vrot.lane.b32.xlu0 %v4304_v38, %s3887_s27  ;;  %1210 = vrot.lane.b32.xlu1 %v4296_v34, %s3888_s6 }
 0x344   :  { %1016 = vrot.lane.b32.xlu0 %v4313_v11, %s3887_s27 }
 0x348   :  { %1204 = vrot.lane.b32.xlu0 %v4304_v38, %s3888_s6 }
 0x34c   :  { %1208 = vrot.lane.b32.xlu0 %v4313_v11, %s3888_s6 }
 0x364   :  { %739 = vadd.xlane.f32.xlu1 %v738_v32  ;;  %v4601_v32 = vpop.permute.xlu1 %998 }
 0x368   :  { %751 = vadd.xlane.f32.xlu1 %v750_v27  ;;  %v4605_v27 = vpop.permute.xlu0 %1188  ;;  %v4607_v4 = vpop.permute.xlu1 %1002 }
 0x369   :  { %5781 = vst [vmem:[#allocation7_spill] sm:$0xff] %v4607_v4 }
 0x36b   :  { %742 = vadd.xlane.f32.xlu0 %v741_v18 }
 0x36c   :  { %757 = vadd.xlane.f32.xlu1 %v756_v19  ;;  %v4609_v18 = vpop.permute.xlu0 %1192  ;;  %v4611_v22 = vpop.permute.xlu1 %1190 }
 0x36d   :  { %5782 = vst [vmem:[#allocation8_spill] sm:$0xff] %v4609_v18  ;;  %5783 = vst [vmem:[#allocation9_spill] sm:$0xff] %v4611_v22 }
 0x36f   :  { %754 = vadd.xlane.f32.xlu0 %v753_v15 }
 0x370   :  { %v4615_v19 = vpop.permute.xlu0 %1008  ;;  %v4617_v5 = vpop.permute.xlu1 %1194 }
 0x371   :  { %5784 = vst [vmem:[#allocation10_spill] sm:$0xff] %v4615_v19  ;;  %5785 = vst [vmem:[#allocation11_spill] sm:$0xff] %v4617_v5 }
 0x373   :  { %760 = vadd.xlane.f32.xlu0 %v759_v20 }
 0x374   :  { %v4621_v17 = vpop.permute.xlu0 %1200  ;;  %v4625_v15 = vpop.permute.xlu1 %1010 }
 0x375   :  { %5786 = vst [vmem:[#allocation12_spill] sm:$0xff] %v4621_v17  ;;  %5787 = vst [vmem:[#allocation13_spill] sm:$0xff] %v4625_v15 }
 0x378   :  { %v4627_v20 = vpop.xlane.xlu0 %730  ;;  %v4631_v47 = vpop.permute.xlu1 %1202 }
 0x379   :  { %5788 = vst [vmem:[#allocation14_spill] sm:$0xff] %v4627_v20  ;;  %5789 = vst [vmem:[#allocation15_spill] sm:$0xff] %v4631_v47 }
 0x37c   :  { %v4635_v37 = vpop.xlane.xlu0 %736  ;;  %v4637_v5 = vpop.xlane.xlu1 %727 }
 0x37d   :  { %862 = vrot.lane.b32.xlu1 %v4320_v1, %s3886_s26  ;;  %5790 = vst [vmem:[#allocation16_spill] sm:$0xff] %v4635_v37  ;;  %5791 = vst [vmem:[#allocation17_spill] sm:$0xff] %v4637_v5  ;;  %v690_v5 = vsel %vm78_vm0, %v4299_v41, 0.0  ;;  %v705_v41 = vsel %vm78_vm0, %v4289_v53, 0.0 }
 0x380   :  { %v4641_v17 = vpop.xlane.xlu0 %748  ;;  %v4643_v15 = vpop.xlane.xlu1 %733 }
 0x381   :  { %1054 = vrot.lane.b32.xlu1 %v4320_v1, %s3887_s27  ;;  %5792 = vst [vmem:[#allocation18_spill] sm:$0xff] %v4641_v17  ;;  %5793 = vst [vmem:[#allocation19_spill] sm:$0xff] %v4643_v15  ;;  %v702_v17 = vsel %vm78_vm0, %v4304_v38, 0.0  ;;  %v711_v38 = vsel %vm78_vm0, %v4296_v34, 0.0 }
 0x384   :  { %v4645_v20 = vpop.permute.xlu0 %844  ;;  %v4647_v19 = vpop.xlane.xlu1 %745 }
 0x385   :  { %1246 = vrot.lane.b32.xlu1 %v4320_v1, %s3888_s6  ;;  %5794 = vst [vmem:[#allocation20_spill] sm:$0xff] %v4647_v19  ;;  %v693_v19 = vsel %vm78_vm0, %v4286_v31, 0.0 }
 0x388   :  { %v4649_v22 = vpop.permute.xlu0 %852  ;;  %v4651_v47 = vpop.permute.xlu1 %846 }
 0x389   :  { %860 = vrot.lane.b32.xlu0 %v4323_v7, %s3886_s26  ;;  %5795 = vst [vmem:[#allocation21_spill] sm:$0xff] %v4651_v47 }
 0x38c   :  { %v4653_v18 = vpop.permute.xlu0 %856  ;;  %v4655_v37 = vpop.permute.xlu1 %854 }
 0x38d   :  { %1052 = vrot.lane.b32.xlu0 %v4323_v7, %s3887_s27  ;;  %5796 = vst [vmem:[#allocation22_spill] sm:$0xff] %v4653_v18  ;;  %5797 = vst [vmem:[#allocation23_spill] sm:$0xff] %v4655_v37  ;;  %v708_v18 = vsel %vm78_vm0, %v4313_v11, 0.0 }
 0x390   :  { %v4659_v4 = vpop.permute.xlu0 %1036  ;;  %v4663_v15 = vpop.permute.xlu1 %858 }
 0x391   :  { %1244 = vrot.lane.b32.xlu0 %v4323_v7, %s3888_s6  ;;  %5798 = vst [vmem:[#allocation24_spill] sm:$0xff] %v4659_v4  ;;  %5799 = vst [vmem:[#allocation25_spill] sm:$0xff] %v4663_v15  ;;  %v714_v4 = vsel %vm78_vm0, %v4329_v60, 0.0 }
 0x394   :  { %v4669_v37 = vpop.permute.xlu0 %1228 }
 0x395   :  { %5800 = vst [vmem:[#allocation26_spill] sm:$0xff] %v4669_v37  ;;  %v762_v37 = vsel %vm78_vm0, %v4323_v7, 0.0  ;;  %v717_v7 = vsel %vm78_vm0, %v4326_v9, 0.0 }
 0x3a9   :  { %691 = vadd.xlane.f32.xlu1 %v690_v5  ;;  %v4673_v5 = vpop.permute.xlu1 %1038 }
 0x3aa   :  { %5801 = vst [vmem:[#allocation27_spill] sm:$0xff] %v4673_v5 }
 0x3ad   :  { %703 = vadd.xlane.f32.xlu1 %v702_v17  ;;  %v4677_v17 = vpop.permute.xlu0 %1044  ;;  %v4679_v31 = vpop.permute.xlu1 %1230 }
 0x3ae   :  { %5802 = vst [vmem:[#allocation28_spill] sm:$0xff] %v4677_v17  ;;  %5803 = vst [vmem:[#allocation29_spill] sm:$0xff] %v4679_v31 }
 0x3b0   :  { %694 = vadd.xlane.f32.xlu0 %v693_v19 }
 0x3b1   :  { %709 = vadd.xlane.f32.xlu1 %v708_v18  ;;  %v4681_v19 = vpop.permute.xlu0 %1048  ;;  %v4683_v11 = vpop.permute.xlu1 %1046 }
 0x3b2   :  { %5804 = vst [vmem:[#allocation30_spill] sm:$0xff] %v4681_v19  ;;  %5805 = vst [vmem:[#allocation31_spill] sm:$0xff] %v4683_v11 }
 0x3b4   :  { %706 = vadd.xlane.f32.xlu0 %v705_v41 }
 0x3b5   :  { %v4687_v18 = vpop.permute.xlu0 %1236  ;;  %v4689_v53 = vpop.permute.xlu1 %1050 }
 0x3b6   :  { %5806 = vst [vmem:[#allocation32_spill] sm:$0xff] %v4687_v18  ;;  %5807 = vst [vmem:[#allocation33_spill] sm:$0xff] %v4689_v53 }
 0x3b8   :  { %712 = vadd.xlane.f32.xlu0 %v711_v38 }
 0x3b9   :  { %v4693_v34 = vpop.permute.xlu0 %1240  ;;  %v4697_v41 = vpop.permute.xlu1 %1238 }
 0x3ba   :  { %5808 = vst [vmem:[#allocation34_spill] sm:$0xff] %v4693_v34  ;;  %5809 = vst [vmem:[#allocation35_spill] sm:$0xff] %v4697_v41 }
 0x3bd   :  { %v4701_v38 = vpop.xlane.xlu0 %679  ;;  %v4705_v18 = vpop.permute.xlu1 %1242 }
 0x3be   :  { %5810 = vst [vmem:[#allocation36_spill] sm:$0xff] %v4705_v18 }
 0x3c1   :  { %v4707_v53 = vpop.xlane.xlu0 %682  ;;  %v4711_v34 = vpop.xlane.xlu1 %685 }
 0x3c2   :  { %830 = vrot.lane.b32.xlu1 %v4326_v9, %s3886_s26 }
 0x3c5   :  { %v4713_v11 = vpop.xlane.xlu0 %688  ;;  %v4715_v41 = vpop.xlane.xlu1 %697 }
 0x3c6   :  { %1022 = vrot.lane.b32.xlu1 %v4326_v9, %s3887_s27 }
 0x3c9   :  { %v4717_v19 = vpop.xlane.xlu0 %700  ;;  %v4719_v31 = vpop.permute.xlu1 %814 }
 0x3ca   :  { %1214 = vrot.lane.b32.xlu1 %v4326_v9, %s3888_s6  ;;  %5811 = vst [vmem:[#allocation37_spill] sm:$0xff] %v4719_v31  ;;  %v765_v31 = vsel %vm78_vm0, %v4320_v1, 0.0  ;;  %v947_v1 = vsel %vm78_vm0, %v4463_v16, 0.0  ;;  %v1139_v9 = vsel %vm78_vm0, %v4467_v45, 0.0  ;;  %v1331_v16 = vsel %vm78_vm0, %v4471_v29, 0.0 }
 0x3cb   :  { %v899_v45 = vsel %vm78_vm0, %v4475_v48, 0.0  ;;  %v1091_v29 = vsel %vm78_vm0, %v4479_v54, 0.0  ;;  %v1283_v48 = vsel %vm78_vm0, %v4489_v36, 0.0  ;;  %v953_v54 = vsel %vm78_vm0, %v4499_v57, 0.0 }
 0x3cc   :  { %v959_v36 = vsel %vm78_vm0, %v4505_v52, 0.0  ;;  %v971_v57 = vsel %vm78_vm0, %v4511_v12, 0.0  ;;  %v1145_v52 = vsel %vm78_vm0, %v4521_v0, 0.0  ;;  %v1151_v12 = vsel %vm78_vm0, %v4531_v58, 0.0 }
 0x3cd   :  { %v4721_v17 = vpop.permute.xlu0 %812  ;;  %v4723_v5 = vpop.permute.xlu1 %822  ;;  %v1337_v0 = vsel %vm78_vm0, %v4541_v2, 0.0  ;;  %v1343_v58 = vsel %vm78_vm0, %v4551_v30, 0.0  ;;  %v1163_v2 = vsel %vm78_vm0, %v4559_v26, 0.0  ;;  %v1355_v30 = vsel %vm78_vm0, %v4567_v49, 0.0 }
 0x3ce   :  { %828 = vrot.lane.b32.xlu0 %v4329_v60, %s3886_s26  ;;  %5812 = vst [vmem:[#allocation38_spill] sm:$0xff] %v4721_v17  ;;  %5813 = vst [vmem:[#allocation39_spill] sm:$0xff] %v4723_v5  ;;  %v944_v5 = vsel %vm78_vm0, %v4459_v6, 0.0  ;;  %v1328_v6 = vsel %vm78_vm0, %v4465_v21, 0.0  ;;  %v1088_v21 = vsel %vm78_vm0, %v4485_v43, 0.0  ;;  %v950_v43 = vsel %vm78_vm0, %v4501_v39, 0.0 }
 0x3cf   :  { %v968_v39 = vsel %vm78_vm0, %v4517_v3, 0.0  ;;  %v1148_v3 = vsel %vm78_vm0, %v4537_v14, 0.0  ;;  %v1340_v14 = vsel %vm78_vm0, %v4557_v35, 0.0  ;;  %v1352_v35 = vsel %vm78_vm0, %v4569_v56, 0.0 }
 0x3d0   :  { %v908_v56 = vsel %vm78_vm0, %v4577_v24, 0.0  ;;  %v1428_v26 = vrot.slane %v4707_v53, %v4054_v25  ;;  %v1424_v24 = vrot.slane %v4701_v38, %v4052_v23 }
 0x3d1   :  { %v4725_v18 = vpop.permute.xlu0 %820  ;;  %v4729_v15 = vpop.permute.xlu1 %826 }
 0x3d2   :  { %1020 = vrot.lane.b32.xlu0 %v4329_v60, %s3887_s27  ;;  %v1429_v53 = vsel %vm1419_vm6, %v1428_v26, %v1424_v24  ;;  %v1100_v26 = vsel %vm78_vm0, %v4597_v40, 0.0  ;;  %v5814_v40 = vld [vmem:[#allocation7_spill] sm:$0xff] }
 0x3d3   :  { %v1103_v24 = vsel %vm78_vm0, %v5814_v40, 0.0 }
 0x3d5   :  { %v4733_v47 = vpop.permute.xlu0 %824  ;;  %v4737_v17 = vpop.permute.xlu1 %1006 }
 0x3d6   :  { %1212 = vrot.lane.b32.xlu0 %v4329_v60, %s3888_s6  ;;  %v1136_v60 = vsel %vm78_vm0, %v4461_v13, 0.0  ;;  %v896_v13 = vsel %vm78_vm0, %v4469_v28, 0.0  ;;  %v1280_v28 = vsel %vm78_vm0, %v4493_v62, 0.0  ;;  %v956_v62 = vsel %vm78_vm0, %v4509_v51, 0.0 }
 0x3d7   :  { %v1142_v51 = vsel %vm78_vm0, %v4527_v42, 0.0  ;;  %v1334_v42 = vsel %vm78_vm0, %v4547_v8, 0.0  ;;  %v1160_v8 = vsel %vm78_vm0, %v4563_v44, 0.0  ;;  %v902_v44 = vsel %vm78_vm0, %v4575_v10, 0.0 }
 0x3d8   :  { %v1437_v10 = vrot.slane %v4713_v11, %v4054_v25  ;;  %v1418_v11 = vrot.slane %v4571_v59, %v4054_v25 }
 0x3ee   :  { %763 = vadd.xlane.f32.xlu1 %v762_v37  ;;  %v4743_v37 = vpop.permute.xlu0 %1004 }
 0x3f2   :  { %715 = vadd.xlane.f32.xlu1 %v714_v4  ;;  %v4747_v4 = vpop.permute.xlu1 %1198 }
 0x3f5   :  { %766 = vadd.xlane.f32.xlu0 %v765_v31 }
 0x3f6   :  { %945 = vadd.xlane.f32.xlu1 %v944_v5  ;;  %v4753_v5 = vpop.permute.xlu0 %1196  ;;  %v4757_v31 = vpop.permute.xlu1 %1014 }
 0x3f9   :  { %718 = vadd.xlane.f32.xlu0 %v717_v7 }
 0x3fa   :  { %1137 = vadd.xlane.f32.xlu1 %v1136_v60  ;;  %v4763_v7 = vpop.permute.xlu0 %1012  ;;  %v4767_v60 = vpop.permute.xlu1 %1018 }
 0x3fd   :  { %948 = vadd.xlane.f32.xlu0 %v947_v1 }
 0x3fe   :  { %1329 = vadd.xlane.f32.xlu1 %v1328_v6  ;;  %v4773_v1 = vpop.permute.xlu0 %1016  ;;  %v4777_v6 = vpop.permute.xlu1 %1206 }
 0x401   :  { %1140 = vadd.xlane.f32.xlu0 %v1139_v9 }
 0x402   :  { %897 = vadd.xlane.f32.xlu1 %v896_v13  ;;  %v4783_v9 = vpop.permute.xlu0 %1204  ;;  %v4787_v13 = vpop.permute.xlu1 %1210 }
 0x405   :  { %1332 = vadd.xlane.f32.xlu0 %v1331_v16 }
 0x406   :  { %1089 = vadd.xlane.f32.xlu1 %v1088_v21  ;;  %v4793_v16 = vpop.permute.xlu0 %1208  ;;  %v4795_v21 = vpop.xlane.xlu1 %739 }
 0x409   :  { %900 = vadd.xlane.f32.xlu0 %v899_v45 }
 0x40a   :  { %1281 = vadd.xlane.f32.xlu1 %v1280_v28  ;;  %v4801_v45 = vpop.xlane.xlu0 %742  ;;  %v4805_v28 = vpop.xlane.xlu1 %751 }
 0x40d   :  { %1092 = vadd.xlane.f32.xlu0 %v1091_v29 }
 0x40e   :  { %951 = vadd.xlane.f32.xlu1 %v950_v43  ;;  %v4811_v29 = vpop.xlane.xlu0 %754  ;;  %v4815_v43 = vpop.xlane.xlu1 %757 }
 0x411   :  { %1284 = vadd.xlane.f32.xlu0 %v1283_v48 }
 0x412   :  { %957 = vadd.xlane.f32.xlu1 %v956_v62  ;;  %v4821_v48 = vpop.xlane.xlu0 %760  ;;  %v4825_v62 = vpop.permute.xlu1 %862 }
 0x415   :  { %954 = vadd.xlane.f32.xlu0 %v953_v54 }
 0x416   :  { %969 = vadd.xlane.f32.xlu1 %v968_v39  ;;  %v4831_v54 = vpop.permute.xlu0 %860  ;;  %v4835_v39 = vpop.permute.xlu1 %1054 }
 0x419   :  { %960 = vadd.xlane.f32.xlu0 %v959_v36 }
 0x41a   :  { %1143 = vadd.xlane.f32.xlu1 %v1142_v51  ;;  %v4841_v36 = vpop.permute.xlu0 %1052  ;;  %v4845_v51 = vpop.permute.xlu1 %1246 }
 0x41d   :  { %972 = vadd.xlane.f32.xlu0 %v971_v57  ;;  %v905_v57 = vsel %vm78_vm0, %v4579_v63, 0.0  ;;  %v1433_v63 = vrot.slane %v4711_v34, %v4052_v23 }
 0x41e   :  { %1149 = vadd.xlane.f32.xlu1 %v1148_v3  ;;  %v4855_v3 = vpop.permute.xlu0 %1244 }
 0x421   :  { %1146 = vadd.xlane.f32.xlu0 %v1145_v52  ;;  %v1413_v52 = vrot.slane %v4573_v55, %v4052_v23  ;;  %v1438_v55 = vsel %vm1419_vm6, %v1437_v10, %v1433_v63 }
 0x422   :  { %1335 = vadd.xlane.f32.xlu1 %v1334_v42  ;;  %v920_v42 = vsel %vm78_vm0, %v4581_v46, 0.0 }
 0x423   :  { %v1420_v46 = vsel %vm1419_vm6, %v1418_v11, %v1413_v52  ;;  %v1286_v52 = vsel %vm78_vm0, %v4605_v27, 0.0 }
 0x424   :  { %v1557_v59 = vsel %vm1556_vm7, %v1429_v53, %v1420_v46  ;;  %v5817_v53 = vld [vmem:[#allocation10_spill] sm:$0xff] }
 0x425   :  { %1152 = vadd.xlane.f32.xlu0 %v1151_v12  ;;  %v911_v12 = vsel %vm78_vm0, %v4583_v50, 0.0  ;;  %v1455_v50 = vrot.slane %v4717_v19, %v4054_v25 }
 0x426   :  { %1341 = vadd.xlane.f32.xlu1 %v1340_v14 }
 0x429   :  { %1338 = vadd.xlane.f32.xlu0 %v1337_v0  ;;  %v1094_v0 = vsel %vm78_vm0, %v4587_v61, 0.0 }
 0x42a   :  { %1161 = vadd.xlane.f32.xlu1 %v1160_v8 }
 0x42d   :  { %1344 = vadd.xlane.f32.xlu0 %v1343_v58  ;;  %v1559_v58 = vsel %vm1558_vm8, %v1438_v55, %v1557_v59  ;;  %v5818_v55 = vld [vmem:[#allocation11_spill] sm:$0xff] }
 0x42e   :  { %1353 = vadd.xlane.f32.xlu1 %v1352_v35  ;;  %v1295_v27 = vsel %vm78_vm0, %v5818_v55, 0.0  ;;  %v5821_v59 = vld [vmem:[#allocation15_spill] sm:$0xff] }
 0x431   :  { %1164 = vadd.xlane.f32.xlu0 %v1163_v2  ;;  %v923_v2 = vsel %vm78_vm0, %v4591_v33, 0.0 }
 0x432   :  { %903 = vadd.xlane.f32.xlu1 %v902_v44  ;;  %v1451_v44 = vrot.slane %v4715_v41, %v4052_v23  ;;  %v1097_v41 = vsel %vm78_vm0, %v4601_v32, 0.0  ;;  %v5816_v32 = vld [vmem:[#allocation9_spill] sm:$0xff] }
 0x433   :  { %v1289_v11 = vsel %vm78_vm0, %v5816_v32, 0.0 }
 0x435   :  { %1356 = vadd.xlane.f32.xlu0 %v1355_v30 }
 0x436   :  { %909 = vadd.xlane.f32.xlu1 %v908_v56  ;;  %v692_v49 = vpop.xlane.xlu1 %691 }
 0x437   :  { %v1442_v14 = vrot.slane %v692_v49, %v4052_v23 }
 0x439   :  { %906 = vadd.xlane.f32.xlu0 %v905_v57  ;;  %v1456_v57 = vsel %vm1419_vm6, %v1455_v50, %v1451_v44  ;;  %v1307_v50 = vsel %vm78_vm0, %v5821_v59, 0.0  ;;  %v5835_v59 = vld [vmem:[#allocation34_spill] sm:$0xff] }
 0x43a   :  { %921 = vadd.xlane.f32.xlu1 %v920_v42  ;;  %v704_v8 = vpop.xlane.xlu1 %703  ;;  %v5815_v42 = vld [vmem:[#allocation8_spill] sm:$0xff] }
 0x43b   :  { %v1460_v56 = vrot.slane %v704_v8, %v4052_v23  ;;  %v1292_v63 = vsel %vm78_vm0, %v5815_v42, 0.0  ;;  %v974_v8 = vsel %vm78_vm0, %v4649_v22, 0.0 }
 0x43d   :  { %912 = vadd.xlane.f32.xlu0 %v911_v12  ;;  %v695_v38 = vpop.xlane.xlu0 %694  ;;  %v1112_v12 = vsel %vm78_vm0, %v5817_v53, 0.0 }
 0x43e   :  { %v1446_v34 = vrot.slane %v695_v38, %v4054_v25  ;;  %1095 = vadd.xlane.f32.xlu1 %v1094_v0  ;;  %v5819_v38 = vld [vmem:[#allocation12_spill] sm:$0xff]  ;;  %v962_v0 = vsel %vm78_vm0, %v4645_v20, 0.0 }
 0x43f   :  { %v1304_v46 = vsel %vm78_vm0, %v5819_v38, 0.0 }
 0x440   :  { %v1447_v35 = vsel %vm1419_vm6, %v1446_v34, %v1442_v14  ;;  %v5820_v14 = vld [vmem:[#allocation13_spill] sm:$0xff] }
 0x441   :  { %v1561_v61 = vsel %vm1560_vm9, %v1447_v35, %v1559_v58  ;;  %924 = vadd.xlane.f32.xlu0 %v923_v2  ;;  %v707_v30 = vpop.xlane.xlu0 %706  ;;  %v1115_v34 = vsel %vm78_vm0, %v5820_v14, 0.0  ;;  %v5822_v58 = vld [vmem:[#allocation21_spill] sm:$0xff]  ;;  %v5823_v2 = vld [vmem:[#allocation22_spill] sm:$0xff] }
 0x442   :  { %v1464_v19 = vrot.slane %v707_v30, %v4054_v25  ;;  %1101 = vadd.xlane.f32.xlu1 %v1100_v26  ;;  %v1563_v10 = vsel %vm1562_vm10, %v1456_v57, %v1561_v61  ;;  %v965_v35 = vsel %vm78_vm0, %v5822_v58, 0.0  ;;  %v980_v44 = vsel %vm78_vm0, %v5823_v2, 0.0  ;;  %v5824_v61 = vld [vmem:[#allocation23_spill] sm:$0xff]  ;;  %v5825_v30 = vld [vmem:[#allocation24_spill] sm:$0xff]  ;;  %v4930_v26 = vpop.xlane.xlu1 %709  ;;  %v5827_v57 = vld [vmem:[#allocation26_spill] sm:$0xff] }
 0x443   :  { %v977_v20 = vsel %vm78_vm0, %v5824_v61, 0.0 }
 0x444   :  { %v1465_v33 = vsel %vm1419_vm6, %v1464_v19, %v1460_v56  ;;  %v1154_v56 = vsel %vm78_vm0, %v5825_v30, 0.0  ;;  %v5826_v19 = vld [vmem:[#allocation25_spill] sm:$0xff] }
 0x445   :  { %1098 = vadd.xlane.f32.xlu0 %v1097_v41  ;;  %v4896_v49 = vsel %vm1564_vm11, %v1465_v33, %v1563_v10  ;;  %v983_v22 = vsel %vm78_vm0, %v5826_v19, 0.0  ;;  %v1346_v33 = vsel %vm78_vm0, %v5827_v57, 0.0  ;;  %v5828_v41 = vld [vmem:[#allocation27_spill] sm:$0xff]  ;;  %v5839_v57 = vld [vmem:[#allocation37_spill] sm:$0xff] }
 0x446   :  { %1287 = vadd.xlane.f32.xlu1 %v1286_v52  ;;  %v1157_v10 = vsel %vm78_vm0, %v5828_v41, 0.0  ;;  %v5829_v52 = vld [vmem:[#allocation28_spill] sm:$0xff]  ;;  %v4940_v42 = vpop.permute.xlu1 %830 }
 0x447   :  { %v1166_v40 = vsel %vm78_vm0, %v5829_v52, 0.0  ;;  %v932_v52 = vsel %vm78_vm0, %v4733_v47, 0.0 }
 0x449   :  { %1104 = vadd.xlane.f32.xlu0 %v1103_v24  ;;  %v4938_v24 = vpop.xlane.xlu0 %712 }
 0x44a   :  { %1293 = vadd.xlane.f32.xlu1 %v1292_v63  ;;  %v5830_v63 = vld [vmem:[#allocation29_spill] sm:$0xff]  ;;  %v4950_v38 = vpop.permute.xlu1 %1022 }
 0x44b   :  { %v1349_v32 = vsel %vm78_vm0, %v5830_v63, 0.0 }
 0x44d   :  { %1290 = vadd.xlane.f32.xlu0 %v1289_v11  ;;  %v5831_v11 = vld [vmem:[#allocation30_spill] sm:$0xff] }
 0x44e   :  { %1113 = vadd.xlane.f32.xlu1 %v1112_v12  ;;  %v1172_v53 = vsel %vm78_vm0, %v5831_v11, 0.0  ;;  %v5832_v12 = vld [vmem:[#allocation31_spill] sm:$0xff]  ;;  %v4960_v58 = vpop.permute.xlu1 %1214  ;;  %v1106_v11 = vsel %vm78_vm0, %v4743_v37, 0.0 }
 0x44f   :  { %v1169_v55 = vsel %vm78_vm0, %v5832_v12, 0.0 }
 0x451   :  { %1296 = vadd.xlane.f32.xlu0 %v1295_v27  ;;  %v4948_v27 = vpop.permute.xlu0 %828 }
 0x452   :  { %1305 = vadd.xlane.f32.xlu1 %v1304_v46  ;;  %v5833_v46 = vld [vmem:[#allocation32_spill] sm:$0xff] }
 0x453   :  { %v1358_v14 = vsel %vm78_vm0, %v5833_v46, 0.0  ;;  %v1109_v46 = vsel %vm78_vm0, %v4737_v17, 0.0  ;;  %v1124_v17 = vsel %vm78_vm0, %v4773_v1, 0.0 }
 0x455   :  { %1116 = vadd.xlane.f32.xlu0 %v1115_v34  ;;  %v5834_v34 = vld [vmem:[#allocation33_spill] sm:$0xff] }
 0x456   :  { %963 = vadd.xlane.f32.xlu1 %v962_v0  ;;  %v1175_v0 = vsel %vm78_vm0, %v5834_v34, 0.0  ;;  %v1301_v34 = vsel %vm78_vm0, %v4747_v4, 0.0  ;;  %v1310_v4 = vsel %vm78_vm0, %v4783_v9, 0.0 }
 0x459   :  { %1308 = vadd.xlane.f32.xlu0 %v1307_v50  ;;  %v1364_v50 = vsel %vm78_vm0, %v5835_v59, 0.0  ;;  %v1121_v59 = vsel %vm78_vm0, %v4757_v31, 0.0  ;;  %v1316_v31 = vsel %vm78_vm0, %v4793_v16, 0.0 }
 0x45a   :  { %975 = vadd.xlane.f32.xlu1 %v974_v8  ;;  %v4958_v8 = vpop.permute.xlu0 %1020 }
 0x45d   :  { %966 = vadd.xlane.f32.xlu0 %v965_v35  ;;  %v5836_v35 = vld [vmem:[#allocation35_spill] sm:$0xff] }
 0x45e   :  { %981 = vadd.xlane.f32.xlu1 %v980_v44  ;;  %v1361_v2 = vsel %vm78_vm0, %v5836_v35, 0.0  ;;  %v5837_v44 = vld [vmem:[#allocation38_spill] sm:$0xff]  ;;  %v4970_v19 = vpop.permute.xlu0 %1212  ;;  %v1127_v35 = vsel %vm78_vm0, %v4767_v60, 0.0  ;;  %v986_v60 = vsel %vm78_vm0, %v4831_v54, 0.0 }
 0x45f   :  { %v914_v61 = vsel %vm78_vm0, %v5837_v44, 0.0  ;;  %v1313_v44 = vsel %vm78_vm0, %v4777_v6, 0.0  ;;  %v1178_v6 = vsel %vm78_vm0, %v4841_v36, 0.0 }
 0x461   :  { %978 = vadd.xlane.f32.xlu0 %v977_v20  ;;  %v5838_v20 = vld [vmem:[#allocation36_spill] sm:$0xff] }
 0x462   :  { %1155 = vadd.xlane.f32.xlu1 %v1154_v56  ;;  %v1367_v30 = vsel %vm78_vm0, %v5838_v20, 0.0  ;;  %v1319_v20 = vsel %vm78_vm0, %v4787_v13, 0.0 }
 0x465   :  { %984 = vadd.xlane.f32.xlu0 %v983_v22  ;;  %v926_v22 = vsel %vm78_vm0, %v4725_v18, 0.0 }
 0x466   :  { %1347 = vadd.xlane.f32.xlu1 %v1346_v33  ;;  %v917_v33 = vsel %vm78_vm0, %v5839_v57, 0.0 }
 0x469   :  { %1158 = vadd.xlane.f32.xlu0 %v1157_v10 }
 0x46a   :  { %1167 = vadd.xlane.f32.xlu1 %v1166_v40  ;;  %v5840_v40 = vld [vmem:[#allocation39_spill] sm:$0xff] }
 0x46b   :  { %v929_v63 = vsel %vm78_vm0, %v5840_v40, 0.0  ;;  %v5843_v40 = vld [vmem:[#allocation6_spill] sm:$0xff] }
 0x46d   :  { %1350 = vadd.xlane.f32.xlu0 %v1349_v32 }
 0x46e   :  { %1173 = vadd.xlane.f32.xlu1 %v1172_v53  ;;  %v935_v53 = vsel %vm78_vm0, %v4729_v15, 0.0  ;;  %v1118_v15 = vsel %vm78_vm0, %v4763_v7, 0.0 }
 0x471   :  { %1170 = vadd.xlane.f32.xlu0 %v1169_v55  ;;  %v1298_v55 = vsel %vm78_vm0, %v4753_v5, 0.0 }
 0x472   :  { %1359 = vadd.xlane.f32.xlu1 %v1358_v14 }
 0x475   :  { %1176 = vadd.xlane.f32.xlu0 %v1175_v0 }
 0x476   :  { %1365 = vadd.xlane.f32.xlu1 %v1364_v50 }
 0x479   :  { %1362 = vadd.xlane.f32.xlu0 %v1361_v2 }
 0x47a   :  { %915 = vadd.xlane.f32.xlu1 %v914_v61 }
 0x47b   :  { %v4968_v56 = vpop.xlane.xlu1 %763 }
 0x47d   :  { %1368 = vadd.xlane.f32.xlu0 %v1367_v30 }
 0x47e   :  { %927 = vadd.xlane.f32.xlu1 %v926_v22  ;;  %v5841_v22 = vld [vmem:[#allocation17_spill] sm:$0xff] }
 0x47f   :  { %v4976_v41 = vpop.xlane.xlu1 %715  ;;  %v1496_v57 = vrot.slane %v5841_v22, %v4052_v23  ;;  %v1514_v22 = vrot.slane %v4795_v21, %v4052_v23 }
 0x481   :  { %918 = vadd.xlane.f32.xlu0 %v917_v33  ;;  %v989_v33 = vsel %vm78_vm0, %v4825_v62, 0.0 }
 0x482   :  { %v4978_v10 = vpop.xlane.xlu0 %766  ;;  %933 = vadd.xlane.f32.xlu1 %v932_v52  ;;  %v5842_v52 = vld [vmem:[#allocation19_spill] sm:$0xff] }
 0x483   :  { %v4984_v32 = vpop.xlane.xlu1 %945  ;;  %v1505_v13 = vrot.slane %v5842_v52, %v4052_v23  ;;  %v941_v52 = vsel %vm78_vm0, %v4940_v42, 0.0  ;;  %v1532_v42 = vrot.slane %v4805_v28, %v4052_v23 }
 0x485   :  { %930 = vadd.xlane.f32.xlu0 %v929_v63  ;;  %v1491_v63 = vrot.slane %v5843_v40, %v4054_v25 }
 0x486   :  { %v4986_v18 = vpop.xlane.xlu0 %718  ;;  %1107 = vadd.xlane.f32.xlu1 %v1106_v11  ;;  %v5844_v11 = vld [vmem:[#allocation14_spill] sm:$0xff] }
 0x487   :  { %v4992_v12 = vpop.xlane.xlu1 %1137 }
 0x489   :  { %936 = vadd.xlane.f32.xlu0 %v935_v53  ;;  %v1500_v53 = vrot.slane %v5844_v11, %v4054_v25  ;;  %v5107_v11 = vld [vmem:[%s5740_s1] sm:$0xff] }
 0x48a   :  { %v4994_v47 = vpop.xlane.xlu0 %948  ;;  %1299 = vadd.xlane.f32.xlu1 %v1298_v55  ;;  %v938_v55 = vsel %vm78_vm0, %v4948_v27, 0.0  ;;  %v1518_v27 = vrot.slane %v4801_v45, %v4054_v25  ;;  %v1478_v45 = vrot.slane %v4976_v41, %v4052_v23  ;;  %v1536_v41 = vrot.slane %v4811_v29, %v4054_v25 }
 0x48b   :  { %v5000_v14 = vpop.xlane.xlu1 %1329  ;;  %v1541_v29 = vrot.slane %v4815_v43, %v4052_v23  ;;  %vm2157_vm14 = vcmp.gt.f32.partialorder %v5107_v11, 0.5 }
 0x48c   :  { %v1519_v21 = vsel %vm1419_vm6, %v1518_v27, %v1514_v22  ;;  %v1537_v43 = vsel %vm1419_vm6, %v1536_v41, %v1532_v42 }
 0x48d   :  { %1110 = vadd.xlane.f32.xlu0 %v1109_v46  ;;  %v5845_v46 = vld [vmem:[#allocation16_spill] sm:$0xff] }
 0x48e   :  { %v5002_v37 = vpop.xlane.xlu0 %1140  ;;  %1119 = vadd.xlane.f32.xlu1 %v1118_v15  ;;  %v1509_v62 = vrot.slane %v5845_v46, %v4054_v25  ;;  %v5846_v15 = vld [vmem:[#allocation5_spill] sm:$0xff]  ;;  %v1322_v46 = vsel %vm78_vm0, %v4970_v19, 0.0 }
 0x48f   :  { %v5008_v0 = vpop.xlane.xlu1 %897 }
 0x491   :  { %1302 = vadd.xlane.f32.xlu0 %v1301_v34  ;;  %v1487_v34 = vrot.slane %v5846_v15, %v4052_v23 }
 0x492   :  { %v5010_v5 = vpop.xlane.xlu0 %1332  ;;  %1125 = vadd.xlane.f32.xlu1 %v1124_v17  ;;  %v1501_v17 = vsel %vm1419_vm6, %v1500_v53, %v1496_v57  ;;  %v1545_v53 = vrot.slane %v4821_v48, %v4054_v25  ;;  %v1133_v48 = vsel %vm78_vm0, %v4950_v38, 0.0  ;;  %v1370_v38 = vsel %vm78_vm0, %v4855_v3, 0.0 }
 0x493   :  { %v5016_v50 = vpop.xlane.xlu1 %1089 }
 0x495   :  { %1122 = vadd.xlane.f32.xlu0 %v1121_v59  ;;  %v1473_v59 = vrot.slane %v4938_v24, %v4054_v25 }
 0x496   :  { %v5018_v7 = vpop.xlane.xlu0 %900  ;;  %1311 = vadd.xlane.f32.xlu1 %v1310_v4  ;;  %v1181_v4 = vsel %vm78_vm0, %v4835_v39, 0.0  ;;  %v1130_v39 = vsel %vm78_vm0, %v4958_v8, 0.0 }
 0x497   :  { %v5024_v2 = vpop.xlane.xlu1 %1281 }
 0x499   :  { %1128 = vadd.xlane.f32.xlu0 %v1127_v35 }
 0x49a   :  { %v5026_v1 = vpop.xlane.xlu0 %1092  ;;  %1317 = vadd.xlane.f32.xlu1 %v1316_v31  ;;  %v1510_v31 = vsel %vm1419_vm6, %v1509_v62, %v1505_v13  ;;  %v5848_v13 = vld [vmem:[#allocation20_spill] sm:$0xff]  ;;  %v1554_v62 = vrot.slane %v4978_v10, %v4054_v25  ;;  %v1550_v10 = vrot.slane %v4968_v56, %v4052_v23  ;;  %v5148_v56 = vld [vmem:[%s5740_s1 + $0x8] sm:$0xff] }
 0x49b   :  { %v5032_v61 = vpop.xlane.xlu1 %951  ;;  %v1523_v40 = vrot.slane %v5848_v13, %v4052_v23  ;;  %vm2158_vm2 = vcmp.gt.f32.partialorder %v5148_v56, 0.5 }
 0x49d   :  { %1314 = vadd.xlane.f32.xlu0 %v1313_v44  ;;  %v1482_v44 = vrot.slane %v4986_v18, %v4054_v25  ;;  %v5847_v18 = vld [vmem:[#allocation18_spill] sm:$0xff] }
 0x49e   :  { %v5034_v9 = vpop.xlane.xlu0 %1284  ;;  %987 = vadd.xlane.f32.xlu1 %v986_v60  ;;  %v1492_v60 = vsel %vm1419_vm6, %v1491_v63, %v1487_v34  ;;  %v1527_v57 = vrot.slane %v5847_v18, %v4054_v25 }
 0x49f   :  { %v5040_v30 = vpop.xlane.xlu1 %957  ;;  %v1483_v63 = vsel %vm1419_vm6, %v1482_v44, %v1478_v45  ;;  %v1325_v44 = vsel %vm78_vm0, %v4960_v58, 0.0  ;;  %v1373_v58 = vsel %vm78_vm0, %v4845_v51, 0.0 }
 0x4a1   :  { %1320 = vadd.xlane.f32.xlu0 %v1319_v20  ;;  %v1469_v20 = vrot.slane %v4930_v26, %v4052_v23 }
 0x4a2   :  { %v5042_v16 = vpop.xlane.xlu0 %954  ;;  %1179 = vadd.xlane.f32.xlu1 %v1178_v6  ;;  %v1570_v6 = vsel %vm1556_vm7, %v1501_v17, %v1492_v60  ;;  %v1546_v17 = vsel %vm1419_vm6, %v1545_v53, %v1541_v29 }
 0x4a3   :  { %v5050_v54 = vpop.xlane.xlu1 %969  ;;  %v1474_v26 = vsel %vm1419_vm6, %v1473_v59, %v1469_v20 }
 0x4a4   :  { %v1567_v15 = vsel %vm1566_vm12, %v1474_v26, %v4896_v49  ;;  %v1528_v49 = vsel %vm1419_vm6, %v1527_v57, %v1523_v40 }
 0x4a5   :  { %990 = vadd.xlane.f32.xlu0 %v989_v33  ;;  %v1571_v33 = vsel %vm1558_vm8, %v1510_v31, %v1570_v6  ;;  %v1569_v19 = vsel %vm1568_vm13, %v1483_v63, %v1567_v15  ;;  %v1555_v31 = vsel %vm1419_vm6, %v1554_v62, %v1550_v10 }
 0x4a6   :  { %v5058_v36 = vpop.xlane.xlu0 %960  ;;  %939 = vadd.xlane.f32.xlu1 %v938_v55  ;;  %v1572_v28 = vsel %vm1560_vm9, %v1519_v21, %v1571_v33 }
 0x4a7   :  { %v5071_v35 = vpop.xlane.xlu1 %1143  ;;  %v1573_v27 = vsel %vm1562_vm10, %v1528_v49, %v1572_v28  ;;  %v1810_v28 = vrot.slane %v5026_v1, %v4054_v25 }
 0x4a8   :  { %v1574_v3 = vsel %vm1564_vm11, %v1537_v43, %v1573_v27  ;;  %v1806_v43 = vrot.slane %v5016_v50, %v4052_v23 }
 0x4a9   :  { %1182 = vadd.xlane.f32.xlu0 %v1181_v4  ;;  %v5141_v4 = vsel %vm2157_vm14, %v1569_v19, -inf  ;;  %v1575_v20 = vsel %vm1566_vm12, %v1546_v17, %v1574_v3 }
 0x4aa   :  { %v5081_v24 = vpop.xlane.xlu0 %972  ;;  %1131 = vadd.xlane.f32.xlu1 %v1130_v39  ;;  %5849 = vst [vmem:[#allocation7_spill] sm:$0xff] %v5141_v4  ;;  %v2168_v6 = vsel %vm2167_vm15, %v5141_v4, -inf  ;;  %v1576_v22 = vsel %vm1568_vm13, %v1555_v31, %v1575_v20 }
 0x4ab   :  { %v5096_v8 = vpop.xlane.xlu1 %1149  ;;  %v5168_v18 = vsel %vm2158_vm2, %v1576_v22, -inf }
 0x4ac   :  { %5850 = vst [vmem:[#allocation8_spill] sm:$0xff] %v5168_v18  ;;  %v2171_v33 = vsel %vm2167_vm15, %v5168_v18, -inf }
 0x4ad   :  { %942 = vadd.xlane.f32.xlu0 %v941_v52 }
 0x4ae   :  { %v5113_v55 = vpop.xlane.xlu0 %1146  ;;  %1323 = vadd.xlane.f32.xlu1 %v1322_v46 }
 0x4af   :  { %v5126_v34 = vpop.xlane.xlu1 %1335 }
 0x4b1   :  { %1134 = vadd.xlane.f32.xlu0 %v1133_v48 }
 0x4b2   :  { %v5135_v59 = vpop.xlane.xlu0 %1152  ;;  %1371 = vadd.xlane.f32.xlu1 %v1370_v38  ;;  %v1811_v38 = vsel %vm1419_vm6, %v1810_v28, %v1806_v43 }
 0x4b3   :  { %v5152_v60 = vpop.xlane.xlu1 %1341 }
 0x4b5   :  { %1326 = vadd.xlane.f32.xlu0 %v1325_v44 }
 0x4b6   :  { %v5156_v39 = vpop.xlane.xlu0 %1338  ;;  %2169 = vmax.xlane.f32.xlu1 %v2168_v6  ;;  %v2002_v6 = vrot.slane %v5034_v9, %v4054_v25 }
 0x4b7   :  { %v5164_v45 = vpop.xlane.xlu1 %1161 }
 0x4b9   :  { %1374 = vadd.xlane.f32.xlu0 %v1373_v58 }
 0x4ba   :  { %v5170_v57 = vpop.xlane.xlu0 %1344 }
 0x4bb   :  { %v5174_v26 = vpop.xlane.xlu1 %1353 }
 0x4bd   :  { %2172 = vmax.xlane.f32.xlu0 %v2171_v33  ;;  %v1998_v33 = vrot.slane %v5024_v2, %v4052_v23 }
 0x4be   :  { %v5176_v52 = vpop.xlane.xlu0 %1164 }
 0x4bf   :  { %v5178_v13 = vpop.xlane.xlu1 %903 }
 0x4c2   :  { %v5180_v51 = vpop.xlane.xlu0 %1356 }
 0x4c3   :  { %v5182_v40 = vpop.xlane.xlu1 %909 }
 0x4c6   :  { %v5184_v21 = vpop.xlane.xlu0 %906 }
 0x4c7   :  { %v5186_v41 = vpop.xlane.xlu1 %921 }
 0x4ca   :  { %v5188_v63 = vpop.xlane.xlu0 %912 }
 0x4cb   :  { %v1096_v42 = vpop.xlane.xlu1 %1095 }
 0x4cc   :  { %v1815_v62 = vrot.slane %v1096_v42, %v4052_v23 }
 0x4ce   :  { %v5190_v53 = vpop.xlane.xlu0 %924 }
 0x4cf   :  { %v1102_v46 = vpop.xlane.xlu1 %1101 }
 0x4d0   :  { %v1824_v49 = vrot.slane %v1102_v46, %v4052_v23 }
 0x4d2   :  { %v1099_v29 = vpop.xlane.xlu0 %1098 }
 0x4d3   :  { %v1819_v15 = vrot.slane %v1099_v29, %v4054_v25  ;;  %v1288_v48 = vpop.xlane.xlu1 %1287 }
 0x4d4   :  { %v2007_v20 = vrot.slane %v1288_v48, %v4052_v23 }
 0x4d5   :  { %v1820_v19 = vsel %vm1419_vm6, %v1819_v15, %v1815_v62  ;;  %v2003_v62 = vsel %vm1419_vm6, %v2002_v6, %v1998_v33  ;;  %v1686_v6 = vrot.slane %v4984_v32, %v4052_v23 }
 0x4d6   :  { %v1105_v10 = vpop.xlane.xlu0 %1104  ;;  %v1947_v27 = vsel %vm1556_vm7, %v1820_v19, %v1811_v38  ;;  %v1708_v38 = vrot.slane %v5058_v36, %v4054_v25 }
 0x4d7   :  { %v1828_v17 = vrot.slane %v1105_v10, %v4054_v25  ;;  %v1294_v31 = vpop.xlane.xlu1 %1293 }
 0x4d8   :  { %v2016_v46 = vrot.slane %v1294_v31, %v4052_v23 }
 0x4d9   :  { %v1829_v44 = vsel %vm1419_vm6, %v1828_v17, %v1824_v49  ;;  %v1699_v49 = vrot.slane %v5042_v16, %v4054_v25  ;;  %v1704_v16 = vrot.slane %v5040_v30, %v4052_v23  ;;  %v1726_v30 = vrot.slane %v5081_v24, %v4054_v25 }
 0x4da   :  { %v5205_v1 = vsel %vm1558_vm8, %v1829_v44, %v1947_v27  ;;  %v1291_v3 = vpop.xlane.xlu0 %1290  ;;  %v1690_v27 = vrot.slane %v4994_v47, %v4054_v25  ;;  %v1695_v44 = vrot.slane %v5032_v61, %v4052_v23 }
 0x4db   :  { %v2011_v50 = vrot.slane %v1291_v3, %v4054_v25  ;;  %v1114_v22 = vpop.xlane.xlu1 %1113  ;;  %v1709_v47 = vsel %vm1419_vm6, %v1708_v38, %v1704_v16 }
 0x4dc   :  { %v1842_v43 = vrot.slane %v1114_v22, %v4052_v23  ;;  %v1700_v36 = vsel %vm1419_vm6, %v1699_v49, %v1695_v44  ;;  %v1691_v61 = vsel %vm1419_vm6, %v1690_v27, %v1686_v6 }
 0x4dd   :  { %v2012_v58 = vsel %vm1419_vm6, %v2011_v50, %v2007_v20 }
 0x4de   :  { %v1297_v42 = vpop.xlane.xlu0 %1296  ;;  %v2139_v28 = vsel %vm1556_vm7, %v2012_v58, %v2003_v62 }
 0x4df   :  { %v2020_v29 = vrot.slane %v1297_v42, %v4054_v25  ;;  %v1306_v15 = vpop.xlane.xlu1 %1305 }
 0x4e0   :  { %v2034_v3 = vrot.slane %v1306_v15, %v4052_v23  ;;  %v1722_v15 = vrot.slane %v5050_v54, %v4052_v23 }
 0x4e1   :  { %v2021_v48 = vsel %vm1419_vm6, %v2020_v29, %v2016_v46  ;;  %v1762_v46 = vsel %vm1556_vm7, %v1700_v36, %v1691_v61 }
 0x4e2   :  { %v5220_v9 = vsel %vm1558_vm8, %v2021_v48, %v2139_v28  ;;  %v1117_v19 = vpop.xlane.xlu0 %1116  ;;  %v1763_v32 = vsel %vm1558_vm8, %v1709_v47, %v1762_v46 }
 0x4e3   :  { %v1846_v2 = vrot.slane %v1117_v19, %v4054_v25  ;;  %v964_v10 = vpop.xlane.xlu1 %963 }
 0x4e4   :  { %v1713_v33 = vrot.slane %v964_v10, %v4052_v23 }
 0x4e5   :  { %v5227_v17 = vsel %vm1419_vm6, %v1846_v2, %v1842_v43  ;;  %v1727_v2 = vsel %vm1419_vm6, %v1726_v30, %v1722_v15 }
 0x4e6   :  { %v1309_v31 = vpop.xlane.xlu0 %1308 }
 0x4e7   :  { %v2038_v20 = vrot.slane %v1309_v31, %v4054_v25  ;;  %v976_v50 = vpop.xlane.xlu1 %975 }
 0x4e8   :  { %v1731_v19 = vrot.slane %v976_v50, %v4052_v23 }
 0x4e9   :  { %v2039_v22 = vsel %vm1419_vm6, %v2038_v20, %v2034_v3 }
 0x4ea   :  { %v967_v58 = vpop.xlane.xlu0 %966 }
 0x4eb   :  { %v1717_v42 = vrot.slane %v967_v58, %v4054_v25  ;;  %v5250_v29 = vpop.xlane.xlu1 %981 }
 0x4ed   :  { %v1718_v62 = vsel %vm1419_vm6, %v1717_v42, %v1713_v33 }
 0x4ee   :  { %v1764_v28 = vsel %vm1560_vm9, %v1718_v62, %v1763_v32  ;;  %v979_v48 = vpop.xlane.xlu0 %978 }
 0x4ef   :  { %v1735_v43 = vrot.slane %v979_v48, %v4054_v25  ;;  %v5260_v10 = vpop.xlane.xlu1 %1155  ;;  %v1765_v24 = vsel %vm1562_vm10, %v1727_v2, %v1764_v28 }
 0x4f1   :  { %v1736_v49 = vsel %vm1419_vm6, %v1735_v43, %v1731_v19 }
 0x4f2   :  { %v5265_v38 = vsel %vm1564_vm11, %v1736_v49, %v1765_v24  ;;  %v5267_v31 = vpop.xlane.xlu0 %984 }
 0x4f3   :  { %v1348_v54 = vpop.xlane.xlu1 %1347 }
 0x4f4   :  { %v2097_v20 = vrot.slane %v1348_v54, %v4052_v23 }
 0x4f6   :  { %v5269_v27 = vpop.xlane.xlu0 %1158 }
 0x4f7   :  { %v5271_v44 = vpop.xlane.xlu1 %1167 }
 0x4fa   :  { %v1351_v3 = vpop.xlane.xlu0 %1350 }
 0x4fb   :  { %v2101_v16 = vrot.slane %v1351_v3, %v4054_v25  ;;  %v5275_v50 = vpop.xlane.xlu1 %1173 }
 0x4fd   :  { %v5278_v6 = vsel %vm1419_vm6, %v2101_v16, %v2097_v20 }
 0x4fe   :  { %v5280_v36 = vpop.xlane.xlu0 %1170 }
 0x4ff   :  { %v5282_v47 = vpop.xlane.xlu1 %1359 }
 0x502   :  { %v5284_v58 = vpop.xlane.xlu0 %1176 }
 0x503   :  { %v5286_v61 = vpop.xlane.xlu1 %1365 }
 0x504   :  { %5851 = vst [vmem:[#allocation9_spill] sm:$0xff] %v5286_v61 }
 0x506   :  { %v5288_v33 = vpop.xlane.xlu0 %1362 }
 0x507   :  { %v5290_v42 = vpop.xlane.xlu1 %915 }
 0x50a   :  { %v5292_v46 = vpop.xlane.xlu0 %1368 }
 0x50b   :  { %v5294_v30 = vpop.xlane.xlu1 %927 }
 0x50e   :  { %v5296_v32 = vpop.xlane.xlu0 %918 }
 0x50f   :  { %v5298_v62 = vpop.xlane.xlu1 %933 }
 0x512   :  { %v5300_v15 = vpop.xlane.xlu0 %930 }
 0x513   :  { %v1108_v28 = vpop.xlane.xlu1 %1107 }
 0x514   :  { %v1833_v2 = vrot.slane %v1108_v28, %v4052_v23 }
 0x516   :  { %v5302_v48 = vpop.xlane.xlu0 %936 }
 0x517   :  { %v1300_v19 = vpop.xlane.xlu1 %1299 }
 0x518   :  { %v2025_v16 = vrot.slane %v1300_v19, %v4052_v23  ;;  %v1891_v19 = vrot.slane %v5113_v55, %v4054_v25  ;;  %v2083_v55 = vrot.slane %v5156_v39, %v4054_v25  ;;  %v1614_v39 = vrot.slane %v5008_v0, %v4052_v23 }
 0x519   :  { %v1918_v0 = vrot.slane %v5176_v52, %v4054_v25 }
 0x51a   :  { %v1111_v43 = vpop.xlane.xlu0 %1110 }
 0x51b   :  { %v1837_v24 = vrot.slane %v1111_v43, %v4054_v25  ;;  %v5306_v49 = vpop.xlane.xlu1 %1119 }
 0x51d   :  { %v1838_v54 = vsel %vm1419_vm6, %v1837_v24, %v1833_v2 }
 0x51e   :  { %v1949_v3 = vsel %vm1560_vm9, %v1838_v54, %v5205_v1  ;;  %v1303_v20 = vpop.xlane.xlu0 %1302 }
 0x51f   :  { %v2029_v4 = vrot.slane %v1303_v20, %v4054_v25  ;;  %v5315_v18 = vsel %vm1562_vm10, %v5227_v17, %v1949_v3  ;;  %v5317_v61 = vpop.xlane.xlu1 %1125  ;;  %v1882_v17 = vrot.slane %v5002_v37, %v4054_v25  ;;  %v2074_v3 = vrot.slane %v5010_v5, %v4054_v25 }
 0x520   :  { %v2079_v5 = vrot.slane %v5126_v34, %v4052_v23  ;;  %v1636_v34 = vrot.slane %v5188_v63, %v4054_v25  ;;  %v2088_v63 = vrot.slane %v5152_v60, %v4052_v23 }
 0x521   :  { %v2030_v28 = vsel %vm1419_vm6, %v2029_v4, %v2025_v16  ;;  %v1887_v4 = vrot.slane %v5071_v35, %v4052_v23  ;;  %v1896_v16 = vrot.slane %v5096_v8, %v4052_v23  ;;  %v1627_v8 = vrot.slane %v5184_v21, %v4054_v25 }
 0x522   :  { %v2141_v43 = vsel %vm1560_vm9, %v2030_v28, %v5220_v9  ;;  %v5322_v2 = vpop.xlane.xlu0 %1122  ;;  %v1900_v9 = vrot.slane %v5135_v59, %v4054_v25  ;;  %v2070_v59 = vrot.slane %v5000_v14, %v4052_v23  ;;  %v1744_v21 = vrot.slane %v5267_v31, %v4054_v25 }
 0x523   :  { %v5325_v1 = vsel %vm1562_vm10, %v2039_v22, %v2141_v43  ;;  %v5327_v24 = vpop.xlane.xlu1 %1311  ;;  %v1878_v22 = vrot.slane %v4992_v12, %v4052_v23  ;;  %v1892_v37 = vsel %vm1419_vm6, %v1891_v19, %v1887_v4  ;;  %v1618_v12 = vrot.slane %v5018_v7, %v4054_v25 }
 0x524   :  { %v1901_v43 = vsel %vm1419_vm6, %v1900_v9, %v1896_v16  ;;  %v1909_v19 = vrot.slane %v5269_v27, %v4054_v25  ;;  %v2075_v14 = vsel %vm1419_vm6, %v2074_v3, %v2070_v59  ;;  %v1623_v9 = vrot.slane %v5178_v13, %v4052_v23 }
 0x525   :  { %v1883_v35 = vsel %vm1419_vm6, %v1882_v17, %v1878_v22  ;;  %v2084_v17 = vsel %vm1419_vm6, %v2083_v55, %v2079_v5  ;;  %v1905_v27 = vrot.slane %v5260_v10, %v4052_v23  ;;  %v1619_v22 = vsel %vm1419_vm6, %v1618_v12, %v1614_v39 }
 0x526   :  { %v5333_v54 = vpop.xlane.xlu0 %1128  ;;  %v1954_v7 = vsel %vm1556_vm7, %v1892_v37, %v1883_v35  ;;  %v1632_v55 = vrot.slane %v5182_v40, %v4052_v23  ;;  %v1914_v13 = vrot.slane %v5164_v45, %v4052_v23  ;;  %v1628_v31 = vsel %vm1419_vm6, %v1627_v8, %v1623_v9 }
 0x527   :  { %v5345_v20 = vpop.xlane.xlu1 %1317  ;;  %v1955_v3 = vsel %vm1558_vm8, %v1901_v43, %v1954_v7  ;;  %v1740_v10 = vrot.slane %v5250_v29, %v4052_v23  ;;  %v1910_v37 = vsel %vm1419_vm6, %v1909_v19, %v1905_v27  ;;  %v5394_v16 = vsel %vm1556_vm7, %v2084_v17, %v2075_v14 }
 0x528   :  { %v2092_v35 = vrot.slane %v5170_v57, %v4054_v25  ;;  %v1637_v40 = vsel %vm1419_vm6, %v1636_v34, %v1632_v55  ;;  %v1645_v59 = vrot.slane %v5296_v32, %v4054_v25  ;;  %v1919_v45 = vsel %vm1419_vm6, %v1918_v0, %v1914_v13 }
 0x529   :  { %v1650_v5 = vrot.slane %v5186_v41, %v4052_v23  ;;  %v1745_v29 = vsel %vm1419_vm6, %v1744_v21, %v1740_v10  ;;  %v1927_v39 = vrot.slane %v5280_v36, %v4054_v25  ;;  %v1755_v43 = vsel %vm1556_vm7, %v1628_v31, %v1619_v22 }
 0x52a   :  { %v5357_v28 = vpop.xlane.xlu0 %1314  ;;  %v1956_v57 = vsel %vm1560_vm9, %v1910_v37, %v1955_v3  ;;  %v1936_v8 = vrot.slane %v5284_v58, %v4054_v25  ;;  %v1641_v32 = vrot.slane %v5290_v42, %v4052_v23  ;;  %v1756_v14 = vsel %vm1558_vm8, %v1637_v40, %v1755_v43 }
 0x52b   :  { %v988_v4 = vpop.xlane.xlu1 %987  ;;  %v1923_v41 = vrot.slane %v5271_v44, %v4052_v23  ;;  %v1654_v17 = vrot.slane %v5190_v53, %v4054_v25  ;;  %v1932_v34 = vrot.slane %v5275_v50, %v4052_v23  ;;  %v1767_v42 = vsel %vm1566_vm12, %v1745_v29, %v5265_v38 }
 0x52c   :  { %v1749_v7 = vrot.slane %v988_v4, %v4052_v23  ;;  %v1646_v58 = vsel %vm1419_vm6, %v1645_v59, %v1641_v32  ;;  %v1957_v9 = vsel %vm1562_vm10, %v1919_v45, %v1956_v57  ;;  %v1663_v4 = vrot.slane %v5300_v15, %v4054_v25 }
 0x52d   :  { %v1928_v44 = vsel %vm1419_vm6, %v1927_v39, %v1923_v41  ;;  %v1937_v53 = vsel %vm1419_vm6, %v1936_v8, %v1932_v34  ;;  %v1659_v50 = vrot.slane %v5294_v30, %v4052_v23  ;;  %v1672_v27 = vrot.slane %v5302_v48, %v4054_v25 }
 0x52e   :  { %v5385_v52 = vpop.xlane.xlu0 %1320  ;;  %v1757_v3 = vsel %vm1560_vm9, %v1646_v58, %v1756_v14  ;;  %v1655_v31 = vsel %vm1419_vm6, %v1654_v17, %v1650_v5  ;;  %v1958_v30 = vsel %vm1564_vm11, %v1928_v44, %v1957_v9  ;;  %v1668_v48 = vrot.slane %v5298_v62, %v4052_v23 }
 0x52f   :  { %v1180_v12 = vpop.xlane.xlu1 %1179  ;;  %v1664_v40 = vsel %vm1419_vm6, %v1663_v4, %v1659_v50  ;;  %v1855_v59 = vrot.slane %v5322_v2, %v4054_v25  ;;  %v1959_v45 = vsel %vm1566_vm12, %v1937_v53, %v1958_v30  ;;  %v1758_v5 = vsel %vm1562_vm10, %v1655_v31, %v1757_v3 }
 0x530   :  { %v1941_v55 = vrot.slane %v1180_v12, %v4052_v23  ;;  %v1673_v29 = vsel %vm1419_vm6, %v1672_v27, %v1668_v48  ;;  %v1864_v62 = vrot.slane %v5333_v54, %v4054_v25  ;;  %v1851_v57 = vrot.slane %v5306_v49, %v4052_v23 }
 0x531   :  { %v1759_v54 = vsel %vm1564_vm11, %v1664_v40, %v1758_v5  ;;  %v1860_v14 = vrot.slane %v5317_v61, %v4052_v23  ;;  %v2056_v61 = vrot.slane %v5385_v52, %v4054_v25  ;;  %v2052_v44 = vrot.slane %v5345_v20, %v4052_v23 }
 0x532   :  { %v991_v19 = vpop.xlane.xlu0 %990  ;;  %v1856_v41 = vsel %vm1419_vm6, %v1855_v59, %v1851_v57  ;;  %v1760_v60 = vsel %vm1566_vm12, %v1673_v29, %v1759_v54  ;;  %v2119_v4 = vrot.slane %v5288_v33, %v4054_v25  ;;  %v2115_v33 = vrot.slane %v5282_v47, %v4052_v23 }
 0x533   :  { %v1753_v36 = vrot.slane %v991_v19, %v4054_v25  ;;  %v940_v0 = vpop.xlane.xlu1 %939  ;;  %v2093_v19 = vsel %vm1419_vm6, %v2092_v35, %v2088_v63  ;;  %v2106_v63 = vrot.slane %v5174_v26, %v4052_v23  ;;  %v1865_v35 = vsel %vm1419_vm6, %v1864_v62, %v1860_v14 }
 0x534   :  { %v1677_v2 = vrot.slane %v940_v0, %v4052_v23  ;;  %v2147_v26 = vsel %vm1558_vm8, %v2093_v19, %v5394_v16  ;;  %v1951_v52 = vsel %vm1564_vm11, %v1856_v41, %v5315_v18  ;;  %v2110_v16 = vrot.slane %v5180_v51, %v4054_v25  ;;  %v5853_v19 = vld [vmem:[#allocation8_spill] sm:$0xff] }
 0x535   :  { %v1754_v21 = vsel %vm1419_vm6, %v1753_v36, %v1749_v7  ;;  %v2047_v7 = vrot.slane %v5357_v28, %v4054_v25  ;;  %v2043_v28 = vrot.slane %v5327_v24, %v4052_v23  ;;  %v1952_v50 = vsel %vm1566_vm12, %v1865_v35, %v1951_v52 }
 0x536   :  { %v1183_v22 = vpop.xlane.xlu0 %1182  ;;  %v1768_v38 = vsel %vm1568_vm13, %v1754_v21, %v1767_v42  ;;  %v2128_v18 = vrot.slane %v5292_v46, %v4054_v25  ;;  %v2057_v20 = vsel %vm1419_vm6, %v2056_v61, %v2052_v44  ;;  %v2148_v51 = vsel %vm1560_vm9, %v5278_v6, %v2147_v26  ;;  %v5852_v46 = vld [vmem:[#allocation9_spill] sm:$0xff] }
 0x537   :  { %v1945_v13 = vrot.slane %v1183_v22, %v4054_v25  ;;  %v5441_v15 = vsel %vm2158_vm2, %v1768_v38, -inf  ;;  %v1132_v37 = vpop.xlane.xlu1 %1131  ;;  %v2048_v21 = vsel %vm1419_vm6, %v2047_v7, %v2043_v28  ;;  %v2120_v47 = vsel %vm1419_vm6, %v2119_v4, %v2115_v33 }
 0x538   :  { %v2177_v10 = vsel %vm2167_vm15, %v5441_v15, -inf  ;;  %v1869_v0 = vrot.slane %v1132_v37, %v4052_v23  ;;  %v2143_v31 = vsel %vm1564_vm11, %v2048_v21, %v5325_v1  ;;  %v2111_v40 = vsel %vm1419_vm6, %v2110_v16, %v2106_v63 }
 0x539   :  { %v1946_v12 = vsel %vm1419_vm6, %v1945_v13, %v1941_v55  ;;  %2178 = vmax.xlane.f32.xlu0 %v2177_v10  ;;  %v2124_v13 = vrot.slane %v5852_v46, %v4052_v23  ;;  %v2144_v37 = vsel %vm1566_vm12, %v2057_v20, %v2143_v31 }
 0x53a   :  { %v943_v39 = vpop.xlane.xlu0 %942  ;;  %v1960_v43 = vsel %vm1568_vm13, %v1946_v12, %v1959_v45  ;;  %v2149_v45 = vsel %vm1562_vm10, %v2111_v40, %v2148_v51 }
 0x53b   :  { %v1681_v8 = vrot.slane %v943_v39, %v4054_v25  ;;  %v5465_v32 = vsel %vm2158_vm2, %v1960_v43, -inf  ;;  %v1324_v34 = vpop.xlane.xlu1 %1323  ;;  %v2129_v6 = vsel %vm1419_vm6, %v2128_v18, %v2124_v13  ;;  %v2150_v62 = vsel %vm1564_vm11, %v2120_v47, %v2149_v45 }
 0x53c   :  { %v2183_v49 = vsel %vm2167_vm15, %v5465_v32, -inf  ;;  %v2061_v38 = vrot.slane %v1324_v34, %v4052_v23  ;;  %v2151_v57 = vsel %vm1566_vm12, %v2129_v6, %v2150_v62 }
 0x53d   :  { %v1682_v36 = vsel %vm1419_vm6, %v1681_v8, %v1677_v2  ;;  %2184 = vmax.xlane.f32.xlu0 %v2183_v49  ;;  %v5854_v49 = vld [vmem:[#allocation4_spill] sm:$0xff] }
 0x53e   :  { %v1135_v17 = vpop.xlane.xlu0 %1134  ;;  %v1761_v58 = vsel %vm1568_vm13, %v1682_v36, %v1760_v60  ;;  %v5855_v36 = vld [vmem:[#allocation7_spill] sm:$0xff] }
 0x53f   :  { %v1873_v42 = vrot.slane %v1135_v17, %v4054_v25  ;;  %v5493_v9 = vsel %vm2157_vm14, %v1761_v58, -inf  ;;  %v1372_v30 = vpop.xlane.xlu1 %1371 }
 0x540   :  { %v2174_v24 = vsel %vm2167_vm15, %v5493_v9, -inf  ;;  %v2133_v1 = vrot.slane %v1372_v30, %v4052_v23 }
 0x541   :  { %v1874_v53 = vsel %vm1419_vm6, %v1873_v42, %v1869_v0  ;;  %2175 = vmax.xlane.f32.xlu1 %v2174_v24 }
 0x542   :  { %v1327_v27 = vpop.xlane.xlu0 %1326  ;;  %v1953_v22 = vsel %vm1568_vm13, %v1874_v53, %v1952_v50 }
 0x543   :  { %v2065_v3 = vrot.slane %v1327_v27, %v4054_v25  ;;  %v2163_v55 = vsel %vm2157_vm14, %v1953_v22, -inf  ;;  %v2170_v7 = vpop.xlane.xlu1 %2169 }
 0x544   :  { %v2180_v48 = vsel %vm2167_vm15, %v2163_v55, -inf  ;;  %v2192_v60 = vsub.f32 %v5855_v36, %v2170_v7 }
 0x545   :  { %v2066_v10 = vsel %vm1419_vm6, %v2065_v3, %v2061_v38  ;;  %2181 = vmax.xlane.f32.xlu1 %v2180_v48 }
 0x546   :  { %v1375_v59 = vpop.xlane.xlu0 %1374  ;;  %v2145_v12 = vsel %vm1568_vm13, %v2066_v10, %v2144_v37  ;;  %v2200_v63 = vmul.f32 1.442695, %v2192_v60 }
 0x547   :  { %v2137_v5 = vrot.slane %v1375_v59, %v4054_v25  ;;  %v2165_v29 = vsel %vm2157_vm14, %v2145_v12, -inf }
 0x548   :  { %v2186_v39 = vsel %vm2167_vm15, %v2165_v29, -inf }
 0x549   :  { %v2138_v43 = vsel %vm1419_vm6, %v2137_v5, %v2133_v1  ;;  %2187 = vmax.xlane.f32.xlu1 %v2186_v39 }
 0x54a   :  { %v2173_v2 = vpop.xlane.xlu0 %2172  ;;  %v2152_v8 = vsel %vm1568_vm13, %v2138_v43, %v2151_v57 }
 0x54b   :  { %v2193_v54 = vsub.f32 %v5853_v19, %v2173_v2  ;;  %v2166_v23 = vsel %vm2158_vm2, %v2152_v8, -inf }
 0x54c   :  { %v2189_v25 = vsel %vm2167_vm15, %v2166_v23, -inf }
 0x54d   :  { %v2202_v11 = vmul.f32 1.442695, %v2193_v54  ;;  %2190 = vmax.xlane.f32.xlu0 %v2189_v25 }
 0x54f   :  { %3837 = vpow2.f32 %v2202_v11 }
 0x550   :  { %3839 = vpow2.f32 %v2200_v63 }
 0x559   :  { %v5547_v14 = vpop.eup %3837 }
 0x55a   :  { %3823 = vrot.lane.b32.xlu1 %v5854_v49, %s3886_s26  ;;  %v2219_v41 = vsel %vm2167_vm15, %v5547_v14, 0.0  ;;  %v3840_v56 = vpop.eup %3839  ;;  %s3890_s26 = smov 16  }
 0x55b   :  { %2220 = vadd.xlane.f32.xlu0 %v2219_v41  ;;  %v2216_v35 = vsel %vm2167_vm15, %v3840_v56, 0.0 }
 0x57e   :  { %2217 = vadd.xlane.f32.xlu1 %v2216_v35 }
 0x5c6   :  { %v2179_v61 = vpop.xlane.xlu0 %2178 }
 0x5c7   :  { %v2195_v17 = vsub.f32 %v5441_v15, %v2179_v61 }
 0x5c9   :  { %v2206_v34 = vmul.f32 1.442695, %v2195_v17 }
 0x5ca   :  { %v2185_v58 = vpop.xlane.xlu0 %2184 }
 0x5cb   :  { %3841 = vpow2.f32 %v2206_v34  ;;  %v2197_v28 = vsub.f32 %v5465_v32, %v2185_v58 }
 0x5cd   :  { %v2210_v0 = vmul.f32 1.442695, %v2197_v28 }
 0x5ce   :  { %v2176_v42 = vpop.xlane.xlu1 %2175 }
 0x5cf   :  { %3843 = vpow2.f32 %v2210_v0  ;;  %v2194_v26 = vsub.f32 %v5493_v9, %v2176_v42  ;;  %v2640_v0 = vld [vmem:[%s5741_s9] sm:$0xff]  ;;  %v2641_v42 = vld [vmem:[%s5741_s9 + $0x8] sm:$0xff] }
 0x5d1   :  { %v2204_v52 = vmul.f32 1.442695, %v2194_v26 }
 0x5d2   :  { %v2182_v44 = vpop.xlane.xlu1 %2181 }
 0x5d3   :  { %3845 = vpow2.f32 %v2204_v52  ;;  %v2196_v24 = vsub.f32 %v2163_v55, %v2182_v44  ;;  %v3749_v52 = vpack.c.bf16 %v2641_v42, %v2640_v0  ;;  %v2642_v44 = vld [vmem:[%s5741_s9 + $0x10] sm:$0xff] }
 0x5d5   :  { %v3842_v4 = vpop.eup %3841  ;;  %v2208_v21 = vmul.f32 1.442695, %v2196_v24  ;;  %v2643_v24 = vld [vmem:[%s5741_s9 + $0x18] sm:$0xff] }
 0x5d6   :  { %v2188_v53 = vpop.xlane.xlu1 %2187  ;;  %v2225_v50 = vsel %vm2167_vm15, %v3842_v4, 0.0 }
 0x5d7   :  { %3847 = vpow2.f32 %v2208_v21  ;;  %v2198_v15 = vsub.f32 %v2165_v29, %v2188_v53  ;;  %2226 = vadd.xlane.f32.xlu0 %v2225_v50 }
 0x5d9   :  { %v5559_v16 = vpop.eup %3843  ;;  %v2212_v32 = vmul.f32 1.442695, %v2198_v15 }
 0x5da   :  { %v3824_v18 = vpop.permute.xlu1 %3823  ;;  %v2191_v20 = vpop.xlane.xlu0 %2190  ;;  %v2231_v9 = vsel %vm2167_vm15, %v5559_v16, 0.0 }
 0x5db   :  { %3849 = vpow2.f32 %v2212_v32  ;;  %v3826_v27 = vunpack.i.h.bf16 %v3824_v18  ;;  %v3825_v22 = vunpack.i.l.bf16 %v3824_v18  ;;  %v2199_v33 = vsub.f32 %v2166_v23, %v2191_v20  ;;  %2232 = vadd.xlane.f32.xlu0 %v2231_v9 }
 0x5dd   :  { %v3846_v38 = vpop.eup %3845  ;;  %v3737_v3 = vpack.c.bf16 %v3826_v27, %v3825_v22  ;;  %v2214_v55 = vmul.f32 1.442695, %v2199_v33  ;;  %v3470_v33 = vld [vmem:[%s5742_s8] ss:$0 sm:$0xff] }
 0x5de   :  { %v2222_v51 = vsel %vm2167_vm15, %v3846_v38, 0.0 }
 0x5df   :  { %3851 = vpow2.f32 %v2214_v55  ;;  %2223 = vadd.xlane.f32.xlu1 %v2222_v51  ;;  %3738 = vmatprep.subr.bf16.mxu0 %v3737_v3 }
 0x5e0   :  { %3740 = vmatpush3.bf16.msra.mxu0 %v3737_v3 }
 0x5e1   :  { %v3848_v46 = vpop.eup %3847 }
 0x5e2   :  { %v2228_v13 = vsel %vm2167_vm15, %v3848_v46, 0.0 }
 0x5e3   :  { %2229 = vadd.xlane.f32.xlu1 %v2228_v13 }
 0x5e5   :  { %v3850_v31 = vpop.eup %3849 }
 0x5e6   :  { %v2234_v30 = vsel %vm2167_vm15, %v3850_v31, 0.0 }
 0x5e7   :  { %2235 = vadd.xlane.f32.xlu1 %v2234_v30 }
 0x5e8   :  { %v2221_v10 = vpop.xlane.xlu0 %2220 }
 0x5e9   :  { %v3852_v48 = vpop.eup %3851  ;;  %3853 = vrcp.f32 %v2221_v10 }
 0x5ea   :  { %v2237_v47 = vsel %vm2167_vm15, %v3852_v48, 0.0 }
 0x5eb   :  { %2238 = vadd.xlane.f32.xlu0 %v2237_v47 }
 0x5f3   :  { %v3854_v40 = vpop.eup %3853 }
 0x5f4   :  { %v2249_v12 = vmul.f32 %v3854_v40, %v5547_v14 }
 0x5f8   :  { %3833 = vrot.lane.b32.xlu1 %v5854_v49, %s3888_s6 }
 0x601   :  { %3828 = vrot.lane.b32.xlu0 %v5854_v49, %s3887_s27  ;;  %s3891_s27 = smov 24  }
 0x60b   :  { %v2218_v37 = vpop.xlane.xlu1 %2217 }
 0x60c   :  { %3855 = vrcp.f32 %v2218_v37  ;;  %v5857_v37 = vld [vmem:[#allocation2_spill] sm:$0xff] }
 0x616   :  { %v3856_v6 = vpop.eup %3855 }
 0x617   :  { %v2248_v59 = vmul.f32 %v3856_v6, %v3840_v56 }
 0x619   :  { %3605 = vmatprep.mubr.msk.f32.mxu1 %vm2167_vm15, %v2248_v59 }
 0x61a   :  { %3606 = vmatmul.mubr.msk.f32.vlgmr.msra.gmra.mrb[2].mxu1 %vm2167_vm15, %v2249_v12 }
 0x664   :  { %v2227_v45 = vpop.xlane.xlu0 %2226 }
 0x665   :  { %3857 = vrcp.f32 %v2227_v45 }
 0x668   :  { %v2233_v29 = vpop.xlane.xlu0 %2232 }
 0x66c   :  { %v2224_v1 = vpop.xlane.xlu1 %2223 }
 0x66d   :  { %3859 = vrcp.f32 %v2224_v1 }
 0x66f   :  { %v3858_v39 = vpop.eup %3857 }
 0x670   :  { %v2230_v5 = vpop.xlane.xlu1 %2229  ;;  %v2251_v19 = vmul.f32 %v3858_v39, %v3842_v4  ;;  %v3753_v4 = vpack.c.bf16 %v2643_v24, %v2642_v44 }
 0x671   :  { %3861 = vrcp.f32 %v2230_v5 }
 0x674   :  { %v2236_v62 = vpop.xlane.xlu1 %2235 }
 0x675   :  { %3863 = vrcp.f32 %v2236_v62 }
 0x676   :  { %3865 = vrcp.f32 %v2233_v29 }
 0x677   :  { %v3860_v43 = vpop.eup %3859 }
 0x678   :  { %v3834_v57 = vpop.permute.xlu1 %3833  ;;  %v2239_v2 = vpop.xlane.xlu0 %2238  ;;  %v2250_v8 = vmul.f32 %v3860_v43, %v3846_v38 }
 0x679   :  { %v3836_v54 = vunpack.i.h.bf16 %v3834_v57  ;;  %v3835_v23 = vunpack.i.l.bf16 %v3834_v57  ;;  %3867 = vrcp.f32 %v2239_v2 }
 0x67a   :  { %3612 = vmatprep.mubr.msk.f32.mxu0 %vm2167_vm15, %v2250_v8  ;;  %v2770_v8 = vld [vmem:[%s5743_s12] sm:$0xff] }
 0x67b   :  { %v3862_v25 = vpop.eup %3861  ;;  %v3745_v11 = vpack.c.bf16 %v3836_v54, %v3835_v23  ;;  %3613 = vmatmul.mubr.msk.f32.vlgmr.msra.gmra.mrb[4].mxu0 %vm2167_vm15, %v2251_v19  ;;  %v2771_v19 = vld [vmem:[%s5743_s12 + $0x8] sm:$0xff]  ;;  %v2772_v54 = vld [vmem:[%s5743_s12 + $0x10] sm:$0xff] }
 0x67c   :  { %v3829_v14 = vpop.permute.xlu0 %3828  ;;  %v2252_v49 = vmul.f32 %v3862_v25, %v3848_v46  ;;  %v3757_v23 = vpack.c.bf16 %v2771_v19, %v2770_v8  ;;  %v2773_v25 = vld [vmem:[%s5743_s12 + $0x18] sm:$0xff]  ;;  %v3172_v8 = vld [vmem:[%s5750_s20 + $0x8] sm:$0xff]  ;;  %v3009_v19 = vld [vmem:[%s5749_s18 + $0x10] sm:$0xff] }
 0x67d   :  { %v3831_v41 = vunpack.i.h.bf16 %v3829_v14  ;;  %v3830_v7 = vunpack.i.l.bf16 %v3829_v14  ;;  %3746 = vmatprep.subr.bf16.mxu0 %v3745_v11  ;;  %v2864_v14 = vld [vmem:[%s5744_s14] sm:$0xff] }
 0x67e   :  { %3619 = vmatprep.mubr.msk.f32.mxu1 %vm2167_vm15, %v2252_v49  ;;  %3748 = vmatpush3.bf16.msra.mxu0 %v3745_v11  ;;  %v3761_v11 = vpack.c.bf16 %v2773_v25, %v2772_v54  ;;  %v2865_v49 = vld [vmem:[%s5744_s14 + $0x8] sm:$0xff]  ;;  %v3010_v54 = vld [vmem:[%s5749_s18 + $0x18] sm:$0xff] }
 0x67f   :  { %v3864_v36 = vpop.eup %3863  ;;  %v3741_v60 = vpack.c.bf16 %v3831_v41, %v3830_v7  ;;  %3758 = vmatprep.subr.bf16.mxu0 %v3757_v23  ;;  %v2866_v41 = vld [vmem:[%s5744_s14 + $0x10] sm:$0xff]  ;;  %v3765_v7 = vpack.c.bf16 %v2865_v49, %v2864_v14  ;;  %v3785_v25 = vpack.c.bf16 %v3010_v54, %v3009_v19  ;;  %v3174_v14 = vld [vmem:[%s5750_s20 + $0x18] sm:$0xff] }
 0x680   :  { %v3866_v63 = vpop.eup %3865  ;;  %v2254_v56 = vmul.f32 %v3864_v36, %v3850_v31  ;;  %v2867_v36 = vld [vmem:[%s5744_s14 + $0x18] sm:$0xff] }
 0x681   :  { %3742 = vmatprep.subr.bf16.mxu1 %v3741_v60  ;;  %v2253_v61 = vmul.f32 %v3866_v63, %v5559_v16  ;;  %v2868_v63 = vld [vmem:[%s5744_s14 + $0x20] sm:$0xff] }
 0x682   :  { %3744 = vmatpush3.bf16.msra.mxu1 %v3741_v60  ;;  %3626 = vmatprep.mubr.msk.f32.mxu0 %vm2167_vm15, %v2254_v56  ;;  %v3769_v60 = vpack.c.bf16 %v2867_v36, %v2866_v41  ;;  %v2869_v56 = vld [vmem:[%s5744_s14 + $0x28] sm:$0xff]  ;;  %v3092_v41 = vld [vmem:[%s5751_s19] sm:$0xff] }
 0x683   :  { %v3868_v35 = vpop.eup %3867  ;;  %3750 = vmatprep.subr.bf16.mxu1 %v3749_v52 }
 0x684   :  { %v2255_v17 = vmul.f32 %v3868_v35, %v3852_v48  ;;  %v5856_v48 = vld [vmem:[#allocation3_spill] sm:$0xff]  ;;  %v3773_v35 = vpack.c.bf16 %v2869_v56, %v2868_v63 }
 0x685   :  { %3620 = vmatmul.mubr.msk.f32.vlgmr.msra.gmra.mrb[4].mxu1 %vm2167_vm15, %v2253_v61 }
 0x686   :  { %3627 = vmatmul.mubr.msk.f32.vlgmr.msra.gmra.mrb[6].mxu0 %vm2167_vm15, %v2255_v17  ;;  %3752 = vmatpush3.bf16.msra.mxu1 %v3749_v52 }
 0x687   :  { %3754 = vmatprep.subr.bf16.mxu1 %v3753_v4  ;;  %3760 = vmatpush3.bf16.msra.mxu0 %v3757_v23 }
 0x688   :  { %3762 = vmatprep.subr.bf16.mxu0 %v3761_v11 }
 0x68a   :  { %3756 = vmatpush3.bf16.msra.mxu1 %v3753_v4  ;;  %v3474_v4 = vld [vmem:[%s5746_s11] ss:$0 sm:$0xff] }
 0x68b   :  { %3764 = vmatpush3.bf16.msra.mxu0 %v3761_v11  ;;  %3766 = vmatprep.subr.bf16.mxu1 %v3765_v7  ;;  %v3173_v11 = vld [vmem:[%s5750_s20 + $0x10] sm:$0xff] }
 0x68c   :  { %v3801_v49 = vpack.c.bf16 %v3174_v14, %v3173_v11 }
 0x6ed   :  { %v3607_v34 = vpop.f32.mrb[2].mxu1 }
 0x6ee   :  { %v2328_v58 = vpop.f32.mrb[3].mxu1 }
 0x74e   :  { %v3614_v28 = vpop.f32.mrb[4].mxu0 }
 0x74f   :  { %2604 = vrot.lane.b32.xlu0 %v3614_v28, %s3889_s0  ;;  %v2417_v26 = vpop.f32.mrb[5].mxu0 }
 0x750   :  { %2602 = vrot.lane.b32.xlu1 %v2417_v26, %s3889_s0  ;;  %v3473_v26 = vld [vmem:[%s5745_s10] ss:$0 sm:$0xff] }
 0x758   :  { %v3621_v21 = vpop.f32.mrb[4].mxu1 }
 0x759   :  { %v3628_v53 = vpop.f32.mrb[6].mxu0  ;;  %2612 = vrot.lane.b32.xlu0 %v3621_v21, %s3890_s26  ;;  %v2504_v50 = vpop.f32.mrb[5].mxu1 }
 0x75a   :  { %v2591_v15 = vpop.f32.mrb[7].mxu0  ;;  %2610 = vrot.lane.b32.xlu1 %v2504_v50, %s3890_s26 }
 0x75d   :  { %2620 = vrot.lane.b32.xlu0 %v3628_v53, %s3891_s27 }
 0x75e   :  { %2618 = vrot.lane.b32.xlu1 %v2591_v15, %s3891_s27 }
 0x7c1   :  { %v2605_v16 = vpop.permute.xlu0 %2604 }
 0x7c2   :  { %v2603_v32 = vpop.permute.xlu1 %2602  ;;  %v2625_v9 = vsel %vm78_vm0, %v3607_v34, %v2605_v16  ;;  %v2870_v16 = vld [vmem:[%s5744_s14 + $0x30] sm:$0xff] }
 0x7c3   :  { %v2624_v27 = vsel %vm78_vm0, %v2328_v58, %v2603_v32  ;;  %v2871_v32 = vld [vmem:[%s5744_s14 + $0x38] sm:$0xff] }
 0x7cb   :  { %v2613_v18 = vpop.permute.xlu0 %2612 }
 0x7cc   :  { %v2611_v20 = vpop.permute.xlu1 %2610  ;;  %v2627_v22 = vsel %vm2167_vm15, %v2625_v9, %v2613_v18  ;;  %v3777_v18 = vpack.c.bf16 %v2871_v32, %v2870_v16 }
 0x7cd   :  { %v2626_v3 = vsel %vm2167_vm15, %v2624_v27, %v2611_v20  ;;  %v3475_v20 = vld [vmem:[%s5747_s13] ss:$0 sm:$0xff] }
 0x7cf   :  { %v2621_v38 = vpop.permute.xlu0 %2620 }
 0x7d0   :  { %v2630_v55 = vsel %vm2628_vm3, %v2627_v22, %v2621_v38  ;;  %v2619_v51 = vpop.permute.xlu1 %2618 }
 0x7d1   :  { %v2629_v46 = vsel %vm2628_vm3, %v2626_v3, %v2619_v51  ;;  %v2639_v31 = vadd.f32 %v3470_v33, %v2630_v55  ;;  %v3478_v55 = vld [vmem:[%s5748_s15] ss:$0 sm:$0xff] }
 0x7d2   :  { %v2638_v13 = vadd.f32 %v3470_v33, %v2629_v46 }
 0x7d4   :  { %3637 = vmatprep.mubr.msk.f32.mxu1 %vm164_vm1, %v2638_v13 }
 0x7d5   :  { %3638 = vmatmul.mubr.msk.f32.vlgmr.msra.gmra.mrb[6].mxu1 %vm164_vm1, %v2639_v31 }
 0x7d6   :  { %3768 = vmatpush3.bf16.msra.mxu1 %v3765_v7  ;;  %v3093_v7 = vld [vmem:[%s5751_s19 + $0x8] sm:$0xff] }
 0x7d7   :  { %3770 = vmatprep.subr.bf16.mxu1 %v3769_v60  ;;  %v3789_v36 = vpack.c.bf16 %v3093_v7, %v3092_v41 }
 0x7da   :  { %3772 = vmatpush3.bf16.msra.mxu1 %v3769_v60 }
 0x7db   :  { %3774 = vmatprep.subr.bf16.mxu1 %v3773_v35 }
 0x7de   :  { %3776 = vmatpush3.bf16.msra.mxu1 %v3773_v35 }
 0x7df   :  { %3778 = vmatprep.subr.bf16.mxu1 %v3777_v18 }
 0x7e2   :  { %3780 = vmatpush3.bf16.msra.mxu1 %v3777_v18 }
 0x8a8   :  { %v3639_v30 = vpop.f32.mrb[6].mxu1 }
 0x8a9   :  { %v2722_v47 = vadd.f32 %v3639_v30, %v5856_v48  ;;  %v2716_v10 = vpop.f32.mrb[7].mxu1 }
 0x8aa   :  { %v2717_v40 = vadd.f32 %v2716_v10, %v5857_v37 }
 0x8ab   :  { %v2730_v6 = vsel %vm164_vm1, %v2722_v47, 0.0 }
 0x8ac   :  { %2731 = vadd.xlane.f32.xlu0 %v2730_v6  ;;  %v2727_v59 = vsel %vm164_vm1, %v2717_v40, 0.0 }
 0x8ad   :  { %2728 = vadd.xlane.f32.xlu1 %v2727_v59 }
 0x939   :  { %v2732_v12 = vpop.xlane.xlu0 %2731 }
 0x93a   :  { %v2735_v45 = vmul.f32 0.03125, %v2732_v12  ;;  %v2729_v1 = vpop.xlane.xlu1 %2728 }
 0x93b   :  { %v2734_v5 = vmul.f32 0.03125, %v2729_v1 }
 0x93c   :  { %v2737_v29 = vsub.f32 %v2722_v47, %v2735_v45 }
 0x93d   :  { %v2736_v62 = vsub.f32 %v2717_v40, %v2734_v5 }
 0x93e   :  { %v2739_v39 = vmul.f32 %v2737_v29, %v2737_v29 }
 0x93f   :  { %v2738_v43 = vmul.f32 %v2736_v62, %v2736_v62 }
 0x940   :  { %v2743_v57 = vsel %vm164_vm1, %v2739_v39, 0.0  ;;  %v3007_v39 = vld [vmem:[%s5749_s18] sm:$0xff] }
 0x941   :  { %2744 = vadd.xlane.f32.xlu1 %v2743_v57  ;;  %v2740_v2 = vsel %vm164_vm1, %v2738_v43, 0.0  ;;  %v3008_v43 = vld [vmem:[%s5749_s18 + $0x8] sm:$0xff]  ;;  %v3171_v57 = vld [vmem:[%s5750_s20] sm:$0xff] }
 0x942   :  { %2741 = vadd.xlane.f32.xlu0 %v2740_v2  ;;  %v3781_v2 = vpack.c.bf16 %v3008_v43, %v3007_v39  ;;  %v3797_v23 = vpack.c.bf16 %v3172_v8, %v3171_v57 }
 0x944   :  { %3782 = vmatprep.subr.bf16.mxu0 %v3781_v2  ;;  %3798 = vmatprep.subr.bf16.mxu1 %v3797_v23 }
 0x9ce   :  { %v2745_v61 = vpop.xlane.xlu1 %2744 }
 0x9cf   :  { %v2747_v17 = vmul.f32 0.03125, %v2745_v61  ;;  %v2742_v34 = vpop.xlane.xlu0 %2741 }
 0x9d0   :  { %v2746_v58 = vmul.f32 0.03125, %v2742_v34 }
 0x9d1   :  { %v2749_v28 = vadd.f32 1e-05, %v2747_v17 }
 0x9d2   :  { %v2748_v0 = vadd.f32 1e-05, %v2746_v58  ;;  %v3481_v58 = vld [vmem:[%s5752_s16] ss:$0 sm:$0xff] }
 0x9d3   :  { %3869 = vrsqrt.f32 %v2749_v28 }
 0x9d4   :  { %3871 = vrsqrt.f32 %v2748_v0 }
 0x9dd   :  { %v3870_v42 = vpop.eup %3869 }
 0x9de   :  { %v3872_v52 = vpop.eup %3871  ;;  %v2753_v44 = vmul.f32 %v3870_v42, %v2737_v29 }
 0x9df   :  { %v2752_v24 = vmul.f32 %v3872_v52, %v2736_v62 }
 0x9e0   :  { %v2761_v21 = vmul.f32 %v3473_v26, %v2753_v44 }
 0x9e1   :  { %v2760_v53 = vmul.f32 %v3473_v26, %v2752_v24  ;;  %v3482_v26 = vld [vmem:[%s5753_s17] ss:$0 sm:$0xff]  ;;  %v3094_v24 = vld [vmem:[%s5751_s19 + $0x10] sm:$0xff] }
 0x9e2   :  { %v2769_v15 = vadd.f32 %v3474_v4, %v2761_v21 }
 0x9e3   :  { %v2768_v50 = vadd.f32 %v3474_v4, %v2760_v53  ;;  %v3095_v4 = vld [vmem:[%s5751_s19 + $0x18] sm:$0xff] }
 0x9e5   :  { %3648 = vmatprep.mubr.msk.f32.mxu0 %vm164_vm1, %v2768_v50 }
 0x9e6   :  { %3649 = vmatmul.mubr.msk.f32.vlgmr.msra.gmra.mrb[8].mxu0 %vm164_vm1, %v2769_v15 }
 0x9e7   :  { %3784 = vmatpush3.bf16.msra.mxu0 %v3781_v2 }
 0x9e8   :  { %3786 = vmatprep.subr.bf16.mxu0 %v3785_v25 }
 0x9eb   :  { %3788 = vmatpush3.bf16.msra.mxu0 %v3785_v25 }
 0x9ec   :  { %3790 = vmatprep.subr.bf16.mxu0 %v3789_v36 }
 0xab9   :  { %v3650_v9 = vpop.f32.mrb[8].mxu0 }
 0xaba   :  { %v2859_v27 = vadd.f32 %v3650_v9, %v3475_v20  ;;  %v2853_v22 = vpop.f32.mrb[9].mxu0 }
 0xabb   :  { %v2854_v33 = vadd.f32 %v3475_v20, %v2853_v22 }
 0xabc   :  { %v2863_v3 = vmax.f32 %v2859_v27, 0.0 }
 0xabd   :  { %v2862_v38 = vmax.f32 %v2854_v33, 0.0  ;;  %v3340_v33 = vld [vmem:[%s5754_s2 + $0x8] sm:$0xff] }
 0xabf   :  { %3667 = vmatprep.mubr.msk.f32.mxu1 %vm2879_vm4, %v2862_v38  ;;  %v3339_v38 = vld [vmem:[%s5754_s2] sm:$0xff] }
 0xac0   :  { %3668 = vmatmul.mubr.msk.f32.vlgmr.msra.gmra.mrb[8].mxu1 %vm2879_vm4, %v2863_v3  ;;  %vm3341_vm6 = vcmp.gt.f32.partialorder %v3339_v38, 0.5 }
 0xac1   :  { %3800 = vmatpush3.bf16.msra.mxu1 %v3797_v23 }
 0xac2   :  { %3802 = vmatprep.subr.bf16.mxu1 %v3801_v49 }
 0xac5   :  { %3804 = vmatpush3.bf16.msra.mxu1 %v3801_v49 }
 0xb93   :  { %v3669_v51 = vpop.f32.mrb[8].mxu1 }
 0xb94   :  { %v2958_v46 = vadd.f32 %v3669_v51, %v3478_v55  ;;  %v2952_v13 = vpop.f32.mrb[9].mxu1 }
 0xb95   :  { %v2953_v31 = vadd.f32 %v3478_v55, %v2952_v13 }
 0xb96   :  { %v2962_v30 = vadd.f32 %v2958_v46, %v2769_v15 }
 0xb97   :  { %v2961_v48 = vadd.f32 %v2953_v31, %v2768_v50  ;;  %v3793_v50 = vpack.c.bf16 %v3095_v4, %v3094_v24 }
 0xb98   :  { %v2968_v47 = vsel %vm164_vm1, %v2962_v30, 0.0 }
 0xb99   :  { %2969 = vadd.xlane.f32.xlu1 %v2968_v47  ;;  %v2965_v10 = vsel %vm164_vm1, %v2961_v48, 0.0 }
 0xb9a   :  { %2966 = vadd.xlane.f32.xlu0 %v2965_v10 }
 0xc26   :  { %v2970_v37 = vpop.xlane.xlu1 %2969 }
 0xc27   :  { %v2972_v40 = vmul.f32 0.03125, %v2970_v37  ;;  %v2967_v6 = vpop.xlane.xlu0 %2966 }
 0xc28   :  { %v2971_v59 = vmul.f32 0.03125, %v2967_v6 }
 0xc29   :  { %v2974_v12 = vsub.f32 %v2962_v30, %v2972_v40 }
 0xc2a   :  { %v2973_v45 = vsub.f32 %v2961_v48, %v2971_v59 }
 0xc2b   :  { %v2976_v1 = vmul.f32 %v2974_v12, %v2974_v12 }
 0xc2c   :  { %v2975_v5 = vmul.f32 %v2973_v45, %v2973_v45 }
 0xc2d   :  { %v2980_v29 = vsel %vm164_vm1, %v2976_v1, 0.0 }
 0xc2e   :  { %2981 = vadd.xlane.f32.xlu1 %v2980_v29  ;;  %v2977_v62 = vsel %vm164_vm1, %v2975_v5, 0.0 }
 0xc2f   :  { %2978 = vadd.xlane.f32.xlu0 %v2977_v62 }
 0xcbb   :  { %v2982_v60 = vpop.xlane.xlu1 %2981 }
 0xcbc   :  { %v2984_v63 = vmul.f32 0.03125, %v2982_v60  ;;  %v2979_v56 = vpop.xlane.xlu0 %2978 }
 0xcbd   :  { %v2983_v35 = vmul.f32 0.03125, %v2979_v56 }
 0xcbe   :  { %v2986_v61 = vadd.f32 1e-05, %v2984_v63 }
 0xcbf   :  { %v2985_v17 = vadd.f32 1e-05, %v2983_v35 }
 0xcc0   :  { %3873 = vrsqrt.f32 %v2986_v61 }
 0xcc1   :  { %3875 = vrsqrt.f32 %v2985_v17 }
 0xcca   :  { %v3874_v34 = vpop.eup %3873 }
 0xccb   :  { %v3876_v28 = vpop.eup %3875  ;;  %v2990_v0 = vmul.f32 %v3874_v34, %v2974_v12 }
 0xccc   :  { %v2989_v42 = vmul.f32 %v3876_v28, %v2973_v45 }
 0xccd   :  { %v2998_v52 = vmul.f32 %v3481_v58, %v2990_v0 }
 0xcce   :  { %v2997_v44 = vmul.f32 %v3481_v58, %v2989_v42 }
 0xccf   :  { %v3006_v53 = vadd.f32 %v3482_v26, %v2998_v52 }
 0xcd0   :  { %v3005_v21 = vadd.f32 %v3482_v26, %v2997_v44 }
 0xcd2   :  { %3678 = vmatprep.mubr.msk.f32.mxu0 %vm164_vm1, %v3005_v21  ;;  %3700 = vmatprep.mubr.msk.f32.mxu1 %vm164_vm1, %v3005_v21 }
 0xcd3   :  { %3679 = vmatmul.mubr.msk.f32.vlgmr.msra.gmra.mrb[10].mxu0 %vm164_vm1, %v3006_v53  ;;  %3701 = vmatmul.mubr.msk.f32.vlgmr.msra.gmra.mrb[10].mxu1 %vm164_vm1, %v3006_v53 }
 0xcd4   :  { %3792 = vmatpush3.bf16.msra.mxu0 %v3789_v36  ;;  %3689 = vmatprep.mubr.msk.f32.mxu0 %vm164_vm1, %v3005_v21 }
 0xcd5   :  { %3794 = vmatprep.subr.bf16.mxu0 %v3793_v50 }
 0xcd8   :  { %3796 = vmatpush3.bf16.msra.mxu0 %v3793_v50 }
 0xcdb   :  { %3690 = vmatmul.mubr.msk.f32.vlgmr.msra.gmra.mrb[12].mxu0 %vm164_vm1, %v3006_v53  ;;  %vm3342_vm1 = vcmp.gt.f32.partialorder %v3340_v33, 0.5 }
 0xda6   :  { %v3680_v15 = vpop.f32.mrb[10].mxu0  ;;  %v3702_v16 = vpop.f32.mrb[10].mxu1 }
 0xda7   :  { %v3083_v32 = vpop.f32.mrb[11].mxu0  ;;  %v3241_v18 = vpop.f32.mrb[11].mxu1 }
 0xda8   :  { %v3811_v20 = vpack.c.bf16 %v3702_v16, %v3241_v18  ;;  %3707 = vmatprep.mubr.msk.f32.mxu0 %vm78_vm0, %v3083_v32 }
 0xdaa   :  { %3812 = vmatprep.subr.bf16.mxu1 %v3811_v20 }
 0xdab   :  { %3814 = vmatpush3.bf16.msra.mxu1 %v3811_v20 }
 0xdae   :  { %v3691_v9 = vpop.f32.mrb[12].mxu0 }
 0xdaf   :  { %v3162_v27 = vpop.f32.mrb[13].mxu0 }
 0xdb0   :  { %v3805_v22 = vpack.c.bf16 %v3691_v9, %v3162_v27 }
 0xdb2   :  { %3807 = vmatprep.subr.msk.bf16.mxu0 %vm3806_vm5, %v3805_v22 }
 0xdb3   :  { %3810 = vmatpush3.bf16.xpose.msk.msra.mxu0 %vm3806_vm5, %v3805_v22 }
 0xdba   :  { %3708 = vmatmul.mubr.msk.f32.vlgmr.msra.gmra.mrb[14].mxu0 %vm78_vm0, %v3680_v15 }
 0xe8d   :  { %v3709_v3 = vpop.f32.mrb[14].mxu0 }
 0xe8e   :  { %v3338_v55 = vmul.f32 0.125, %v3709_v3  ;;  %v3328_v51 = vpop.f32.mrb[15].mxu0 }
 0xe8f   :  { %v3337_v46 = vmul.f32 0.125, %v3328_v51 }
 0xe90   :  { %v3344_v13 = vsel %vm3342_vm1, -inf, %v3338_v55 }
 0xe91   :  { %v3343_v31 = vsel %vm3341_vm6, -inf, %v3337_v46  ;;  %v3348_v30 = vsel %vm2167_vm15, %v3344_v13, -inf }
 0xe92   :  { %3349 = vmax.xlane.f32.xlu1 %v3348_v30  ;;  %v3345_v48 = vsel %vm2167_vm15, %v3343_v31, -inf }
 0xe93   :  { %3346 = vmax.xlane.f32.xlu0 %v3345_v48 }
 0xf1f   :  { %v3350_v47 = vpop.xlane.xlu1 %3349 }
 0xf20   :  { %v3352_v10 = vsub.f32 %v3344_v13, %v3350_v47  ;;  %v3347_v37 = vpop.xlane.xlu0 %3346 }
 0xf21   :  { %v3351_v40 = vsub.f32 %v3343_v31, %v3347_v37 }
 0xf22   :  { %v3355_v6 = vmul.f32 1.442695, %v3352_v10 }
 0xf23   :  { %v3353_v59 = vmul.f32 1.442695, %v3351_v40 }
 0xf24   :  { %3877 = vpow2.f32 %v3355_v6 }
 0xf25   :  { %3879 = vpow2.f32 %v3353_v59 }
 0xf2e   :  { %v3878_v12 = vpop.eup %3877 }
 0xf2f   :  { %v3880_v45 = vpop.eup %3879  ;;  %v3360_v1 = vsel %vm2167_vm15, %v3878_v12, 0.0 }
 0xf30   :  { %3361 = vadd.xlane.f32.xlu1 %v3360_v1  ;;  %v3357_v5 = vsel %vm2167_vm15, %v3880_v45, 0.0 }
 0xf31   :  { %3358 = vadd.xlane.f32.xlu0 %v3357_v5 }
 0xfbd   :  { %v3362_v29 = vpop.xlane.xlu1 %3361 }
 0xfbe   :  { %3881 = vrcp.f32 %v3362_v29  ;;  %v3359_v62 = vpop.xlane.xlu0 %3358 }
 0xfbf   :  { %3883 = vrcp.f32 %v3359_v62 }
 0xfc8   :  { %v3882_v39 = vpop.eup %3881 }
 0xfc9   :  { %v3884_v43 = vpop.eup %3883  ;;  %v3366_v2 = vmul.f32 %v3882_v39, %v3878_v12 }
 0xfca   :  { %v3365_v57 = vmul.f32 %v3884_v43, %v3880_v45 }
 0xfcc   :  { %3714 = vmatprep.mubr.msk.f32.mxu1 %vm2167_vm15, %v3365_v57 }
 0xfcd   :  { %3715 = vmatmul.mubr.msk.f32.vlgmr.msra.gmra.mrb[12].mxu1 %vm2167_vm15, %v3366_v2 }
0x10a0   :  { %v3716_v8 = vpop.f32.mrb[12].mxu1 }
0x10a1   :  { %3449 = vst.msk [vmem:[%s5755_s21 + $0x8] sm:$0xff] %vm78_vm0, %v3716_v8  ;;  %v3439_v19 = vpop.f32.mrb[13].mxu1 }
0x10a2   :  { %3448 = vst.msk [vmem:[%s5755_s21] sm:$0xff] %vm78_vm0, %v3439_v19 }

</bundles_post_ra>
